<compile_context>
chip_gen: v7x
topology: tpu7x:2x2x1
jax: 0.10.0
libtpu: 0.0.40
codegen_flags: <defaults>
</compile_context>

<pallas_src>
import math

import jax
import jax.numpy as jnp
from jax.experimental import pallas as pl
from jax.experimental.pallas import tpu as pltpu


def encoder_kernel(x_ref, w1_ref, b1_ref, w2_ref, b2_ref, eps_ref, out_ref):
    z_dim = eps_ref.shape[-1]

    # fc1: bf16 operands on the MXU, f32 accumulate; bias + ReLU in f32 (VPU).
    h1 = jnp.dot(x_ref[...], w1_ref[...], preferred_element_type=jnp.float32)
    h1 = jnp.maximum(h1 + b1_ref[...], 0.0)

    # fused fc21||fc22: one (TB,1200) @ (1200, 2*z_dim) matmul, f32 accumulate.
    h2 = jnp.dot(h1.astype(jnp.bfloat16), w2_ref[...],
                 preferred_element_type=jnp.float32)
    h2 = h2 + b2_ref[...]                       # h2 = [mu | logvar], lane-contiguous

    mu = h2[:, :z_dim]
    logvar = h2[:, z_dim:]

    # reparametrize: z = eps * exp(0.5*logvar) + mu   (f32 on VPU, exp on EUP)
    z = eps_ref[...] * jnp.exp(0.5 * logvar) + mu

    # single lane-dense output slab [mu | logvar | z]; h2 is reused unchanged so
    # only one 2-way lane concat is needed.
    out_ref[...] = jnp.concatenate([h2, z], axis=-1)


def encoder_forward(x_nchw, params, eps):
    """x_nchw: (B, 1, 28, 28) float32.  Returns (z, mu, logvar), each (B, z_dim)."""
    B = x_nchw.shape[0]
    w1, b1, w21, b21, w22, b22 = params
    in_dim, hidden = w1.shape
    z_dim = w21.shape[1]

    # --- operand prep (wrapper side) -------------------------------------
    x = x_nchw.reshape(B, -1).astype(jnp.bfloat16)                    # (B, 784)
    w1_bf = w1.astype(jnp.bfloat16)                                   # (784, 1200)
    w2_bf = jnp.concatenate([w21, w22], axis=1).astype(jnp.bfloat16)  # (1200, 2z)
    b1_f32 = b1.astype(jnp.float32)                                   # (1, 1200)
    b2_f32 = jnp.concatenate([b21, b22], axis=1).astype(jnp.float32)  # (1, 2z)
    eps_f32 = eps.astype(jnp.float32)                                 # (B, z_dim)

    # --- batch tiling: weights stay VMEM-resident across batch tiles -----
    if B <= 256:
        tb = max(8, -(-B // 8) * 8)          # round B up to a sublane multiple
    else:
        tb = 256                             # stream large batches in 256-row tiles
    b_pad = -(-B // tb) * tb
    if b_pad != B:
        x = jnp.pad(x, ((0, b_pad - B), (0, 0)))
        eps_f32 = jnp.pad(eps_f32, ((0, b_pad - B), (0, 0)))
    grid = (b_pad // tb,)

    out = pl.pallas_call(
        encoder_kernel,
        out_shape=jax.ShapeDtypeStruct((b_pad, 3 * z_dim), jnp.float32),
        grid_spec=pltpu.PrefetchScalarGridSpec(
            num_scalar_prefetch=0,
            grid=grid,
            in_specs=[
                pl.BlockSpec((tb, in_dim), lambda i: (i, 0)),         # x tile
                pl.BlockSpec((in_dim, hidden), lambda i: (0, 0)),     # w1 (resident)
                pl.BlockSpec((1, hidden), lambda i: (0, 0)),          # b1 (resident)
                pl.BlockSpec((hidden, 2 * z_dim), lambda i: (0, 0)),  # w2 (resident)
                pl.BlockSpec((1, 2 * z_dim), lambda i: (0, 0)),       # b2 (resident)
                pl.BlockSpec((tb, z_dim), lambda i: (i, 0)),          # eps tile
            ],
            out_specs=pl.BlockSpec((tb, 3 * z_dim), lambda i: (i, 0)),
        ),
        compiler_params=pltpu.CompilerParams(
            dimension_semantics=("parallel",)),   # shard batch tiles over TCs
    )(x, w1_bf, b1_f32, w2_bf, b2_f32, eps_f32)

    mu = out[:B, :z_dim]
    logvar = out[:B, z_dim:2 * z_dim]
    z = out[:B, 2 * z_dim:]
    return z, mu, logvar


def init_params(key, input_size, hidden, z_dim):
    """Deterministic init mimicking torch.nn.Linear (uniform +/- 1/sqrt(fan_in)).
    Weights are stored pre-transposed as (in, out)."""
    ks = jax.random.split(key, 6)

    def linear(kw, kb, fan_in, fan_out):
        bound = 1.0 / math.sqrt(fan_in)
        w = jax.random.uniform(kw, (fan_in, fan_out), jnp.float32, -bound, bound)
        b = jax.random.uniform(kb, (1, fan_out), jnp.float32, -bound, bound)
        return w, b

    w1, b1 = linear(ks[0], ks[1], input_size, hidden)
    w21, b21 = linear(ks[2], ks[3], hidden, z_dim)
    w22, b22 = linear(ks[4], ks[5], hidden, z_dim)
    return (w1, b1, w21, b21, w22, b22)


if __name__ == "__main__":
    key = jax.random.PRNGKey(0)
    k_x, k_p, k_eps = jax.random.split(key, 3)

    B, z_dim = 2, 16
    input_size, hidden = 784, 1200          # mnist, conditional=False

    x = jax.random.uniform(k_x, (B, 1, 28, 28), jnp.float32)   # NCHW, like MNIST
    params = init_params(k_p, input_size, hidden, z_dim)
    # TODO(synk): PyTorch samples eps internally with torch.FloatTensor.normal_();
    # here the noise is drawn host-side with jax.random and passed in.
    eps = jax.random.normal(k_eps, (B, z_dim), jnp.float32)

    z, mu, logvar = encoder_forward(x, params, eps)
    jax.block_until_ready((z, mu, logvar))

    # sanity check against pure-JAX f32 reference (loose tolerance: kernel uses
    # bf16 matmul operands with f32 accumulation)
    xf = x.reshape(B, -1)
    w1, b1, w21, b21, w22, b22 = params
    h1_ref = jnp.maximum(xf @ w1 + b1, 0.0)
    mu_ref = h1_ref @ w21 + b21
    lv_ref = h1_ref @ w22 + b22
    z_ref = eps * jnp.exp(0.5 * lv_ref) + mu_ref
    assert jnp.allclose(mu, mu_ref, atol=3e-2, rtol=3e-2)
    assert jnp.allclose(logvar, lv_ref, atol=3e-2, rtol=3e-2)
    assert jnp.allclose(z, z_ref, atol=3e-2, rtol=3e-2)
    assert z.shape == (B, z_dim) and mu.shape == (B, z_dim) and logvar.shape == (B, z_dim)

    print("KERNEL_OK")
</pallas_src>

<mosaic_0001>
module attributes {stable_mosaic.version = 11 : i64} {
  func.func @encoder_kernel(%arg0: i32, %arg1: memref<8x784xbf16, #tpu.memory_space<vmem>>, %arg2: memref<784x1200xbf16, #tpu.memory_space<vmem>>, %arg3: memref<1x1200xf32, #tpu.memory_space<vmem>>, %arg4: memref<1200x32xbf16, #tpu.memory_space<vmem>>, %arg5: memref<1x32xf32, #tpu.memory_space<vmem>>, %arg6: memref<8x16xf32, #tpu.memory_space<vmem>>, %arg7: memref<8x48xf32, #tpu.memory_space<vmem>>) attributes {dimension_semantics = [#tpu.dimension_semantics<parallel>], iteration_bounds = array<i64: 1>, scalar_prefetch = 0 : i64, scratch_operands = 0 : i64, tpu.core_type = #tpu.core_type<tc>, window_params = [{transform_indices = @transform_0, window_bounds = array<i64: 8, 784>}, {pipeline_mode = #tpu.pipeline_mode<synchronous>, transform_indices = @transform_1, window_bounds = array<i64: 784, 1200>}, {pipeline_mode = #tpu.pipeline_mode<synchronous>, transform_indices = @transform_2, window_bounds = array<i64: 1, 1200>}, {pipeline_mode = #tpu.pipeline_mode<synchronous>, transform_indices = @transform_3, window_bounds = array<i64: 1200, 32>}, {pipeline_mode = #tpu.pipeline_mode<synchronous>, transform_indices = @transform_4, window_bounds = array<i64: 1, 32>}, {transform_indices = @transform_5, window_bounds = array<i64: 8, 16>}, {transform_indices = @transform_6, window_bounds = array<i64: 8, 48>}]} {
    %c0 = arith.constant 0 : index
    %c0_0 = arith.constant 0 : index
    %0 = vector.load %arg1[%c0, %c0_0] : memref<8x784xbf16, #tpu.memory_space<vmem>>, vector<8x784xbf16>
    %c0_1 = arith.constant 0 : index
    %c0_2 = arith.constant 0 : index
    %1 = vector.load %arg2[%c0_1, %c0_2] : memref<784x1200xbf16, #tpu.memory_space<vmem>>, vector<784x1200xbf16>
    %cst = arith.constant dense<0.000000e+00> : vector<8x1200xf32>
    %2 = tpu.matmul %0, %1, %cst {dimension_numbers = #tpu.dot_dimension_numbers<[1], [0], [0], [1], [0, 0, 1, 1], [], []>} : vector<8x784xbf16>, vector<784x1200xbf16>, vector<8x1200xf32> -> vector<8x1200xf32>
    %c0_3 = arith.constant 0 : index
    %c0_4 = arith.constant 0 : index
    %3 = vector.load %arg3[%c0_3, %c0_4] : memref<1x1200xf32, #tpu.memory_space<vmem>>, vector<1x1200xf32>
    %4 = vector.broadcast %3 : vector<1x1200xf32> to vector<8x1200xf32>
    %5 = arith.addf %2, %4 : vector<8x1200xf32>
    %cst_5 = arith.constant 0.000000e+00 : f32
    %6 = vector.broadcast %cst_5 : f32 to vector<8x1200xf32>
    %7 = arith.maximumf %5, %6 : vector<8x1200xf32>
    %8 = arith.truncf %7 : vector<8x1200xf32> to vector<8x1200xbf16>
    %c0_6 = arith.constant 0 : index
    %c0_7 = arith.constant 0 : index
    %9 = vector.load %arg4[%c0_6, %c0_7] : memref<1200x32xbf16, #tpu.memory_space<vmem>>, vector<1200x32xbf16>
    %cst_8 = arith.constant dense<0.000000e+00> : vector<8x32xf32>
    %10 = tpu.matmul %8, %9, %cst_8 {dimension_numbers = #tpu.dot_dimension_numbers<[1], [0], [0], [1], [0, 0, 1, 1], [], []>} : vector<8x1200xbf16>, vector<1200x32xbf16>, vector<8x32xf32> -> vector<8x32xf32>
    %c0_9 = arith.constant 0 : index
    %c0_10 = arith.constant 0 : index
    %11 = vector.load %arg5[%c0_9, %c0_10] : memref<1x32xf32, #tpu.memory_space<vmem>>, vector<1x32xf32>
    %12 = vector.broadcast %11 : vector<1x32xf32> to vector<8x32xf32>
    %13 = arith.addf %10, %12 : vector<8x32xf32>
    %14 = vector.extract_strided_slice %13 {offsets = [0, 0], sizes = [8, 16], strides = [1, 1]} : vector<8x32xf32> to vector<8x16xf32>
    %15 = vector.extract_strided_slice %13 {offsets = [0, 16], sizes = [8, 16], strides = [1, 1]} : vector<8x32xf32> to vector<8x16xf32>
    %c0_11 = arith.constant 0 : index
    %c0_12 = arith.constant 0 : index
    %16 = vector.load %arg6[%c0_11, %c0_12] : memref<8x16xf32, #tpu.memory_space<vmem>>, vector<8x16xf32>
    %cst_13 = arith.constant 5.000000e-01 : f32
    %17 = vector.broadcast %cst_13 : f32 to vector<8x16xf32>
    %18 = arith.mulf %17, %15 : vector<8x16xf32>
    %19 = math.exp %18 : vector<8x16xf32>
    %20 = arith.mulf %16, %19 : vector<8x16xf32>
    %21 = arith.addf %20, %14 : vector<8x16xf32>
    %22 = tpu.concatenate %13, %21 in 1 : vector<8x32xf32>, vector<8x16xf32> -> vector<8x48xf32>
    %c0_14 = arith.constant 0 : index
    %c0_15 = arith.constant 0 : index
    %23 = vector.load %arg7[%c0_14, %c0_15] : memref<8x48xf32, #tpu.memory_space<vmem>>, vector<8x48xf32>
    tpu.vector_store %arg7[%c0_14, %c0_15], %22 {strides = array<i32>} : memref<8x48xf32, #tpu.memory_space<vmem>>, vector<8x48xf32>,
    return
  }
  func.func @transform_0(%arg0: i32) -> (i32, i32) {
    %c0_i32 = arith.constant 0 : i32
    %c0_i32_0 = arith.constant 0 : i32
    return %arg0, %c0_i32 : i32, i32
  }
  func.func @transform_1(%arg0: i32) -> (i32, i32) {
    %c0_i32 = arith.constant 0 : i32
    %c0_i32_0 = arith.constant 0 : i32
    %c0_i32_1 = arith.constant 0 : i32
    return %c0_i32, %c0_i32_0 : i32, i32
  }
  func.func @transform_2(%arg0: i32) -> (i32, i32) {
    %c0_i32 = arith.constant 0 : i32
    %c0_i32_0 = arith.constant 0 : i32
    %c0_i32_1 = arith.constant 0 : i32
    return %c0_i32, %c0_i32_0 : i32, i32
  }
  func.func @transform_3(%arg0: i32) -> (i32, i32) {
    %c0_i32 = arith.constant 0 : i32
    %c0_i32_0 = arith.constant 0 : i32
    %c0_i32_1 = arith.constant 0 : i32
    return %c0_i32, %c0_i32_0 : i32, i32
  }
  func.func @transform_4(%arg0: i32) -> (i32, i32) {
    %c0_i32 = arith.constant 0 : i32
    %c0_i32_0 = arith.constant 0 : i32
    %c0_i32_1 = arith.constant 0 : i32
    return %c0_i32, %c0_i32_0 : i32, i32
  }
  func.func @transform_5(%arg0: i32) -> (i32, i32) {
    %c0_i32 = arith.constant 0 : i32
    %c0_i32_0 = arith.constant 0 : i32
    return %arg0, %c0_i32 : i32, i32
  }
  func.func @transform_6(%arg0: i32) -> (i32, i32) {
    %c0_i32 = arith.constant 0 : i32
    %c0_i32_0 = arith.constant 0 : i32
    return %arg0, %c0_i32 : i32, i32
  }
}

</mosaic_0001>

<bundles_post_ra>
// kernel: tpu_custom_call.1
= control target key start
LH: loop header
LB: loop body
LE: loop exit
PB: predicated region body
PF: predicated region fallthrough
CT: control target
= control target key end

     0   :  { %11 = vsyncpa [#allocation3], 0  ;;  %s6971_s0 = inlined_call_operand.hbm [shape: bf16[8,784], index: 0, kind: input, shape index: {}]   ;;  %s6972_s1 = inlined_call_operand.hbm [shape: bf16[784,1200], index: 1, kind: input, shape index: {}]   ;;  %s6973_s2 = inlined_call_operand.hbm [shape: f32[1,1200], index: 2, kind: input, shape index: {}]   ;;  %s6974_s3 = inlined_call_operand.vmem [shape: bf16[1200,32], index: 3, kind: input, shape index: {}]   ;;  %s6975_s4 = inlined_call_operand.hbm [shape: f32[1,32], index: 4, kind: input, shape index: {}]   ;;  %s6976_s5 = inlined_call_operand.hbm [shape: f32[8,16], index: 5, kind: input, shape index: {}]   ;;  %s6977_s6 = inlined_call_operand.hbm [shape: f32[8,48], index: 6, kind: output, shape index: {}]  }
   0x1   :  { %12 = vsyncpa [#allocation6], 0 }
   0x2   :  { %13 = vsyncpa [#allocation9], 0 }
   0x3   :  { %14 = vsyncpa [#allocation4], 0  ;;  %s6501_s21 = smov [#allocation5]   ;;  %s6361_s25 = scalar_lea.hbm %s6972_s1, 62720 }
   0x4   :  { %s30_s22 = sshll.u32 %s6501_s21, 4  ;;  %p6362_p0 = scmp.ne.s32.totalorder %s6972_s1, %s6361_s25  ;;  %s31_s22 = int_to_ptr.vmem [resolvable:$true] %s30_s22 }
   0x5   :  { %p6365_p1 = scmp.lt.u32.totalorder %s6361_s25, %s6972_s1 }
   0x7   :  { %p6367_p2 = pnand %p6365_p1, %p6362_p0 }
   0x9   :  { %6370 = shalt.err (!%p6367_p2)
}
   0xa   :  { %s6371_s30 = scalar_lea.vmem %s31_s22, 62720  ;;  %p6376_p4 = scmp.lt.s32.totalorder %s31_s22, %s31_s22 }
   0xb   :  { %p6372_p3 = scmp.ne.s32.totalorder %s31_s22, %s6371_s30  ;;  %p6377_p5 = scmp.lt.s32.totalorder %s6371_s30, %s6371_s30 }
   0xd   :  { %p6378_p6 = por %p6377_p5, %p6376_p4 }
   0xf   :  { %p6379_p7 = pnand %p6378_p6, %p6372_p3 }
  0x11   :  { %6382 = shalt.err (!%p6379_p7)
}
  0x12   :  { %s6502_s7 = smov 640   ;;  %s6503_s8 = smov 40  }
  0x13   :  { %36 = dma.hbm_to_vmem [thread:$0]  %s6972_s1, 62720, %s31_s22, [#allocation6], %s6502_s7, %s6502_s7, %s6503_s8  }
  0x14   :  { %s6504_s11 = smov [#allocation8]   ;;  %s6505_s13 = smov [#allocation2]  }
  0x15   :  { %s55_s12 = sshll.u32 %s6504_s11, 4  ;;  %s21_s14 = sshll.u32 %s6505_s13, 4  ;;  %s56_s12 = int_to_ptr.vmem [resolvable:$true] %s55_s12  ;;  %s22_s14 = int_to_ptr.vmem [resolvable:$true] %s21_s14 }
  0x16   :  { %s6383_s17 = scalar_lea.hbm %s6975_s4, 16 }
  0x17   :  { %p6384_p8 = scmp.ne.s32.totalorder %s6975_s4, %s6383_s17  ;;  %p6387_p9 = scmp.lt.u32.totalorder %s6383_s17, %s6975_s4 }
  0x19   :  { %p6389_p10 = pnand %p6387_p9, %p6384_p8 }
  0x1b   :  { %6392 = shalt.err (!%p6389_p10)
}
  0x1c   :  { %s6393_s1 = scalar_lea.vmem %s56_s12, 16  ;;  %s6397_s22 = scalar_lea.vmem %s56_s12, 32 }
  0x1d   :  { %p6394_p11 = scmp.ne.s32.totalorder %s56_s12, %s6393_s1  ;;  %p6398_p12 = scmp.lt.s32.totalorder %s56_s12, %s56_s12 }
  0x1e   :  { %p6399_p13 = scmp.lt.s32.totalorder %s6397_s22, %s6393_s1 }
  0x20   :  { %p6400_p0 = por %p6399_p13, %p6398_p12 }
  0x22   :  { %p6401_p1 = pnand %p6400_p0, %p6394_p11 }
  0x24   :  { %6404 = shalt.err (!%p6401_p1)
}
  0x25   :  { %58 = dma.hbm_to_vmem [thread:$0]  %s6975_s4, 16, %s56_s12, [#allocation9]  }
  0x26   :  { %s6405_s27 = scalar_lea.hbm %s6971_s0, 448 }
  0x27   :  { %p6406_p2 = scmp.ne.s32.totalorder %s6971_s0, %s6405_s27  ;;  %p6409_p3 = scmp.lt.u32.totalorder %s6405_s27, %s6971_s0 }
  0x29   :  { %p6411_p4 = pnand %p6409_p3, %p6406_p2 }
  0x2b   :  { %6414 = shalt.err (!%p6411_p4)
}
  0x2c   :  { %s6415_s8 = scalar_lea.vmem %s22_s14, 448  ;;  %p6420_p6 = scmp.lt.s32.totalorder %s22_s14, %s22_s14 }
  0x2d   :  { %p6416_p5 = scmp.ne.s32.totalorder %s22_s14, %s6415_s8  ;;  %p6421_p7 = scmp.lt.s32.totalorder %s6415_s8, %s6415_s8 }
  0x2f   :  { %p6422_p8 = por %p6421_p7, %p6420_p6 }
  0x31   :  { %p6423_p9 = pnand %p6422_p8, %p6416_p5 }
  0x33   :  { %6426 = shalt.err (!%p6423_p9)
}
  0x34   :  { %24 = dma.hbm_to_vmem [thread:$0]  %s6971_s0, 448, %s22_s14, [#allocation3]  }
  0x35   :  { %s6506_s10 = smov [#allocation7]   ;;  %s6507_s12 = smov [#allocation10]  }
  0x36   :  { %s43_s11 = sshll.u32 %s6506_s10, 4  ;;  %s65_s13 = sshll.u32 %s6507_s12, 4  ;;  %s44_s11 = int_to_ptr.vmem [resolvable:$true] %s43_s11  ;;  %s66_s13 = int_to_ptr.vmem [resolvable:$true] %s65_s13 }
  0x37   :  { %s6427_s17 = scalar_lea.hbm %s6973_s2, 160 }
  0x38   :  { %p6428_p10 = scmp.ne.s32.totalorder %s6973_s2, %s6427_s17  ;;  %p6431_p11 = scmp.lt.u32.totalorder %s6427_s17, %s6973_s2 }
  0x3a   :  { %p6433_p12 = pnand %p6431_p11, %p6428_p10 }
  0x3c   :  { %6436 = shalt.err (!%p6433_p12)
}
  0x3d   :  { %s6437_s0 = scalar_lea.vmem %s44_s11, 160  ;;  %p6442_p0 = scmp.lt.s32.totalorder %s44_s11, %s44_s11 }
  0x3e   :  { %p6438_p13 = scmp.ne.s32.totalorder %s44_s11, %s6437_s0  ;;  %p6443_p1 = scmp.lt.s32.totalorder %s6437_s0, %s6437_s0 }
  0x40   :  { %p6444_p2 = por %p6443_p1, %p6442_p0 }
  0x42   :  { %p6445_p3 = pnand %p6444_p2, %p6438_p13 }
  0x44   :  { %6448 = shalt.err (!%p6445_p3)
}
  0x45   :  { %46 = dma.hbm_to_vmem [thread:$0]  %s6973_s2, 160, %s44_s11, [#allocation6]  }
  0x46   :  { %s6449_s24 = scalar_lea.hbm %s6976_s5, 128 }
  0x47   :  { %p6450_p4 = scmp.ne.s32.totalorder %s6976_s5, %s6449_s24  ;;  %p6453_p5 = scmp.lt.u32.totalorder %s6449_s24, %s6976_s5 }
  0x49   :  { %p6455_p6 = pnand %p6453_p5, %p6450_p4 }
  0x4b   :  { %6458 = shalt.err (!%p6455_p6)
}
  0x4c   :  { %s6459_s29 = scalar_lea.vmem %s66_s13, 128  ;;  %p6464_p8 = scmp.lt.s32.totalorder %s66_s13, %s66_s13 }
  0x4d   :  { %p6460_p7 = scmp.ne.s32.totalorder %s66_s13, %s6459_s29  ;;  %p6465_p9 = scmp.lt.s32.totalorder %s6459_s29, %s6459_s29 }
  0x4f   :  { %p6466_p10 = por %p6465_p9, %p6464_p8 }
  0x51   :  { %p6467_p11 = pnand %p6466_p10, %p6460_p7 }
  0x53   :  { %6470 = shalt.err (!%p6467_p11)
}
  0x54   :  { %68 = dma.hbm_to_vmem [thread:$0]  %s6976_s5, 128, %s66_s13, [#allocation9]  }
  0x55   :  { %6493 = dma.done.wait [#allocation3], 448  }
  0x56   :  { %6494 = vsyncadd [#allocation3], 4294966848 }
  0x57   :  { %6495 = dma.done.wait [#allocation6], 62880  }
  0x58   :  { %6496 = vsyncadd [#allocation6], 4294904416 }
  0x59   :  { %6497 = dma.done.wait [#allocation9], 144  }
  0x5a   :  { %6498 = vsyncadd [#allocation9], 4294967152  ;;  %v6508_v0 = vmov 0   ;;  %v5540_v1 = vld [vmem:[#allocation5 + $0x4] ss:$40 sps:$4 sm:$0xff]   ;;  %vm3107_vm0 = vcmask 130048  }
  0x5b   :  { %3266 = vmatprep.mubr.bf16.mxu1 %v6508_v0  ;;  %v5542_v2 = vld [vmem:[#allocation5 + $0xf04] ss:$40 sps:$4 sm:$0xff]   ;;  %3111 = vmatprep.subr.bf16.mxu0 %v5540_v1  ;;  %v5544_v3 = vld [vmem:[#allocation5] ss:$40 sps:$4 sm:$0xff]   ;;  %v5546_v5 = vld [vmem:[#allocation5 + $0x54] ss:$40 sps:$4 sm:$0xff]  }
  0x5c   :  { %v5545_v4 = vld [vmem:[#allocation5 + $0xf00] ss:$40 sps:$4 sm:$0xff]   ;;  %3234 = vmatprep.subr.bf16.mxu1 %v5542_v2  ;;  %3112 = vmatpush1.bf16.msra.mxu0 %v5544_v3  ;;  %v5550_v7 = vld [vmem:[#allocation5 + $0xc] ss:$40 sps:$4 sm:$0xff]   ;;  %v5551_v8 = vld [vmem:[#allocation5 + $0x50] ss:$40 sps:$4 sm:$0xff]  }
  0x5d   :  { %3235 = vmatpush1.bf16.msra.mxu1 %v5545_v4  ;;  %v5548_v6 = vld [vmem:[#allocation5 + $0x8] ss:$40 sps:$4 sm:$0xff]   ;;  %3113 = vmatprep.subr.bf16.mxu0 %v5546_v5  ;;  %v5552_v9 = vld [vmem:[#allocation2 + $0x18] ss:$0 sps:$4 sm:$0xff]   ;;  %v5553_v10 = vld [vmem:[#allocation5 + $0xa4] ss:$40 sps:$4 sm:$0xff]  }
  0x5e   :  { %3275 = vmatprep.subr.bf16.mxu1 %v5550_v7  ;;  %v5555_v11 = vld [vmem:[#allocation5 + $0x58] ss:$40 sps:$4 sm:$0xff]   ;;  %v5557_v12 = vld [vmem:[#allocation5 + $0x5c] ss:$40 sps:$4 sm:$0xff]   ;;  %v5563_v15 = vld [vmem:[#allocation5 + $0xac] ss:$40 sps:$4 sm:$0xff]  }
  0x5f   :  { %v5558_v13 = vld [vmem:[#allocation5 + $0xa0] ss:$40 sps:$4 sm:$0xff]   ;;  %v5559_v14 = vld [vmem:[#allocation5 + $0xf4] ss:$40 sps:$4 sm:$0xff]   ;;  %v5564_v17 = vld [vmem:[#allocation5 + $0xf0] ss:$40 sps:$4 sm:$0xff]  }
  0x60   :  { %5293 = vmatmul.mubr.msk.bf16.vlgmr.msra.gmra.mrb[0].mxu1 %vm3107_vm0, %v5552_v9  ;;  %3114 = vmatpush1.bf16.msra.mxu0 %v5551_v8  ;;  %v5561_v16 = vld [vmem:[#allocation5 + $0xa8] ss:$40 sps:$4 sm:$0xff]   ;;  %v5565_v18 = vld [vmem:[#allocation5 + $0x144] ss:$40 sps:$4 sm:$0xff]   ;;  %v5567_v20 = vld [vmem:[#allocation5 + $0xf8] ss:$40 sps:$4 sm:$0xff]  }
  0x61   :  { %3276 = vmatpush1.bf16.msra.mxu1 %v5548_v6  ;;  %3115 = vmatprep.subr.bf16.mxu0 %v5553_v10  ;;  %v5569_v19 = vld [vmem:[#allocation5 + $0xfc] ss:$40 sps:$4 sm:$0xff]   ;;  %v5570_v21 = vld [vmem:[#allocation5 + $0x140] ss:$40 sps:$4 sm:$0xff]   ;;  %v5575_v23 = vld [vmem:[#allocation5 + $0x14c] ss:$40 sps:$4 sm:$0xff]  }
  0x62   :  { %3277 = vmatprep.subr.bf16.mxu1 %v5557_v12  ;;  %v5571_v22 = vld [vmem:[#allocation5 + $0x194] ss:$40 sps:$4 sm:$0xff]   ;;  %v5573_v24 = vld [vmem:[#allocation5 + $0x148] ss:$40 sps:$4 sm:$0xff]   ;;  %v5577_v26 = vld [vmem:[#allocation5 + $0x1e4] ss:$40 sps:$4 sm:$0xff]  }
  0x63   :  { %v5576_v25 = vld [vmem:[#allocation5 + $0x190] ss:$40 sps:$4 sm:$0xff]   ;;  %v5581_v27 = vld [vmem:[#allocation5 + $0x19c] ss:$40 sps:$4 sm:$0xff]   ;;  %v5582_v29 = vld [vmem:[#allocation5 + $0x1e0] ss:$40 sps:$4 sm:$0xff]  }
  0x64   :  { %3116 = vmatpush1.bf16.msra.mxu0 %v5558_v13  ;;  %v5579_v28 = vld [vmem:[#allocation5 + $0x198] ss:$40 sps:$4 sm:$0xff]   ;;  %v5583_v30 = vld [vmem:[#allocation5 + $0x234] ss:$40 sps:$4 sm:$0xff]   ;;  %v5585_v32 = vld [vmem:[#allocation5 + $0x1e8] ss:$40 sps:$4 sm:$0xff]  }
  0x65   :  { %3278 = vmatpush1.bf16.msra.mxu1 %v5555_v11  ;;  %3117 = vmatprep.subr.bf16.mxu0 %v5559_v14  ;;  %v5587_v31 = vld [vmem:[#allocation5 + $0x1ec] ss:$40 sps:$4 sm:$0xff]   ;;  %v5588_v33 = vld [vmem:[#allocation5 + $0x230] ss:$40 sps:$4 sm:$0xff]   ;;  %v5593_v35 = vld [vmem:[#allocation5 + $0x23c] ss:$40 sps:$4 sm:$0xff]  }
  0x66   :  { %3279 = vmatprep.subr.bf16.mxu1 %v5563_v15  ;;  %v5589_v34 = vld [vmem:[#allocation5 + $0x284] ss:$40 sps:$4 sm:$0xff]   ;;  %v5591_v36 = vld [vmem:[#allocation5 + $0x238] ss:$40 sps:$4 sm:$0xff]   ;;  %v5595_v38 = vld [vmem:[#allocation5 + $0x2d4] ss:$40 sps:$4 sm:$0xff]  }
  0x67   :  { %v5594_v37 = vld [vmem:[#allocation5 + $0x280] ss:$40 sps:$4 sm:$0xff]   ;;  %v5599_v39 = vld [vmem:[#allocation5 + $0x28c] ss:$40 sps:$4 sm:$0xff]   ;;  %v5600_v41 = vld [vmem:[#allocation5 + $0x2d0] ss:$40 sps:$4 sm:$0xff]  }
  0x68   :  { %3118 = vmatpush1.bf16.msra.mxu0 %v5564_v17  ;;  %v5597_v40 = vld [vmem:[#allocation5 + $0x288] ss:$40 sps:$4 sm:$0xff]   ;;  %v5601_v42 = vld [vmem:[#allocation5 + $0x324] ss:$40 sps:$4 sm:$0xff]   ;;  %v5603_v44 = vld [vmem:[#allocation5 + $0x2d8] ss:$40 sps:$4 sm:$0xff]  }
  0x69   :  { %3280 = vmatpush1.bf16.msra.mxu1 %v5561_v16  ;;  %3119 = vmatprep.subr.bf16.mxu0 %v5565_v18  ;;  %v5605_v43 = vld [vmem:[#allocation5 + $0x2dc] ss:$40 sps:$4 sm:$0xff]   ;;  %v5606_v45 = vld [vmem:[#allocation5 + $0x320] ss:$40 sps:$4 sm:$0xff]   ;;  %v5611_v47 = vld [vmem:[#allocation5 + $0x32c] ss:$40 sps:$4 sm:$0xff]  }
  0x6a   :  { %3281 = vmatprep.subr.bf16.mxu1 %v5569_v19  ;;  %v5607_v46 = vld [vmem:[#allocation5 + $0x374] ss:$40 sps:$4 sm:$0xff]   ;;  %v5609_v48 = vld [vmem:[#allocation5 + $0x328] ss:$40 sps:$4 sm:$0xff]   ;;  %v5613_v51 = vld [vmem:[#allocation5 + $0x3c4] ss:$40 sps:$4 sm:$0xff]  }
  0x6b   :  { %v85_v49 = vld [vmem:[#allocation2] sm:$0xff]  ;;  %v5612_v50 = vld [vmem:[#allocation5 + $0x370] ss:$40 sps:$4 sm:$0xff]   ;;  %v5619_v56 = vld [vmem:[#allocation5 + $0x414] ss:$40 sps:$4 sm:$0xff]   ;;  %vm4558_vm1 = vcmask 392192  }
  0x6c   :  { %3120 = vmatpush1.bf16.msra.mxu0 %v5570_v21  ;;  %v6609_v52 = vcombine.high %v85_v49, %v85_v49  ;;  %v5617_v53 = vld [vmem:[#allocation5 + $0x37c] ss:$40 sps:$4 sm:$0xff]   ;;  %v5615_v54 = vld [vmem:[#allocation5 + $0x378] ss:$40 sps:$4 sm:$0xff]   ;;  %v5623_v57 = vld [vmem:[#allocation5 + $0x3cc] ss:$40 sps:$4 sm:$0xff]   ;;  %v6613_v8 = vcombine.low %v85_v49, %v85_v49 }
  0x6d   :  { %3282 = vmatpush1.bf16.msra.mxu1 %v5567_v20  ;;  %3121 = vmatprep.subr.bf16.mxu0 %v5571_v22  ;;  %v5618_v55 = vld [vmem:[#allocation5 + $0x3c0] ss:$40 sps:$4 sm:$0xff]   ;;  %v5624_v59 = vld [vmem:[#allocation5 + $0x410] ss:$40 sps:$4 sm:$0xff]   ;;  %v5625_v60 = vld [vmem:[#allocation5 + $0x464] ss:$40 sps:$4 sm:$0xff]  }
  0x6e   :  { %3283 = vmatprep.subr.bf16.mxu1 %v5575_v23  ;;  %3143 = vmatprep.mubr.bf16.mxu0 %v6609_v52  ;;  %v5621_v58 = vld [vmem:[#allocation5 + $0x3c8] ss:$40 sps:$4 sm:$0xff]   ;;  %v5629_v61 = vld [vmem:[#allocation5 + $0x41c] ss:$40 sps:$4 sm:$0xff]   ;;  %v5627_v62 = vld [vmem:[#allocation5 + $0x418] ss:$40 sps:$4 sm:$0xff]  }
  0x6f   :  { %3307 = vmatprep.mubr.bf16.mxu1 %v6609_v52  ;;  %v5630_v63 = vld [vmem:[#allocation5 + $0x460] ss:$40 sps:$4 sm:$0xff]   ;;  %v5631_v1 = vld [vmem:[#allocation5 + $0x4b4] ss:$40 sps:$4 sm:$0xff]   ;;  %v5636_v4 = vld [vmem:[#allocation5 + $0x4b0] ss:$40 sps:$4 sm:$0xff]  }
  0x70   :  { %3122 = vmatpush1.bf16.msra.mxu0 %v5576_v25  ;;  %v5635_v2 = vld [vmem:[#allocation5 + $0x46c] ss:$40 sps:$4 sm:$0xff]   ;;  %v5633_v3 = vld [vmem:[#allocation5 + $0x468] ss:$40 sps:$4 sm:$0xff]   ;;  %v5643_v6 = vld [vmem:[#allocation5 + $0x4bc] ss:$40 sps:$4 sm:$0xff]  }
  0x71   :  { %3284 = vmatpush1.bf16.msra.mxu1 %v5573_v24  ;;  %3123 = vmatprep.subr.bf16.mxu0 %v5577_v26  ;;  %v5640_v5 = vld [vmem:[#allocation5 + $0x504] ss:$40 sps:$4 sm:$0xff]   ;;  %v5638_v7 = vld [vmem:[#allocation5 + $0x500] ss:$40 sps:$4 sm:$0xff]   ;;  %v5647_v10 = vld [vmem:[#allocation5 + $0x554] ss:$40 sps:$4 sm:$0xff]  }
  0x72   :  { %3285 = vmatprep.subr.bf16.mxu1 %v5581_v27  ;;  %v5641_v9 = vld [vmem:[#allocation5 + $0x4b8] ss:$40 sps:$4 sm:$0xff]   ;;  %v5650_v11 = vld [vmem:[#allocation5 + $0x50c] ss:$40 sps:$4 sm:$0xff]   ;;  %v5648_v13 = vld [vmem:[#allocation5 + $0x508] ss:$40 sps:$4 sm:$0xff]  }
  0x73   :  { %v5645_v12 = vld [vmem:[#allocation5 + $0x550] ss:$40 sps:$4 sm:$0xff]   ;;  %v5653_v14 = vld [vmem:[#allocation5 + $0x5a4] ss:$40 sps:$4 sm:$0xff]   ;;  %v5651_v16 = vld [vmem:[#allocation5 + $0x5a0] ss:$40 sps:$4 sm:$0xff]  }
  0x74   :  { %3124 = vmatpush1.bf16.msra.mxu0 %v5582_v29  ;;  %v5656_v15 = vld [vmem:[#allocation5 + $0x55c] ss:$40 sps:$4 sm:$0xff]   ;;  %v5654_v17 = vld [vmem:[#allocation5 + $0x558] ss:$40 sps:$4 sm:$0xff]   ;;  %v5662_v19 = vld [vmem:[#allocation5 + $0x5ac] ss:$40 sps:$4 sm:$0xff]  }
  0x75   :  { %3286 = vmatpush1.bf16.msra.mxu1 %v5579_v28  ;;  %3125 = vmatprep.subr.bf16.mxu0 %v5583_v30  ;;  %v5659_v18 = vld [vmem:[#allocation5 + $0x5f4] ss:$40 sps:$4 sm:$0xff]   ;;  %v5657_v20 = vld [vmem:[#allocation5 + $0x5f0] ss:$40 sps:$4 sm:$0xff]   ;;  %v5665_v22 = vld [vmem:[#allocation5 + $0x644] ss:$40 sps:$4 sm:$0xff]  }
  0x76   :  { %3287 = vmatprep.subr.bf16.mxu1 %v5587_v31  ;;  %v5660_v21 = vld [vmem:[#allocation5 + $0x5a8] ss:$40 sps:$4 sm:$0xff]   ;;  %v5668_v23 = vld [vmem:[#allocation5 + $0x5fc] ss:$40 sps:$4 sm:$0xff]   ;;  %v5666_v25 = vld [vmem:[#allocation5 + $0x5f8] ss:$40 sps:$4 sm:$0xff]  }
  0x77   :  { %v5663_v24 = vld [vmem:[#allocation5 + $0x640] ss:$40 sps:$4 sm:$0xff]   ;;  %v5671_v26 = vld [vmem:[#allocation5 + $0x694] ss:$40 sps:$4 sm:$0xff]   ;;  %v5669_v28 = vld [vmem:[#allocation5 + $0x690] ss:$40 sps:$4 sm:$0xff]  }
  0x78   :  { %3126 = vmatpush1.bf16.msra.mxu0 %v5588_v33  ;;  %v5674_v27 = vld [vmem:[#allocation5 + $0x64c] ss:$40 sps:$4 sm:$0xff]   ;;  %v5672_v29 = vld [vmem:[#allocation5 + $0x648] ss:$40 sps:$4 sm:$0xff]   ;;  %v5680_v31 = vld [vmem:[#allocation5 + $0x69c] ss:$40 sps:$4 sm:$0xff]  }
  0x79   :  { %3288 = vmatpush1.bf16.msra.mxu1 %v5585_v32  ;;  %3127 = vmatprep.subr.bf16.mxu0 %v5589_v34  ;;  %v5677_v30 = vld [vmem:[#allocation5 + $0x6e4] ss:$40 sps:$4 sm:$0xff]   ;;  %v5675_v33 = vld [vmem:[#allocation5 + $0x6e0] ss:$40 sps:$4 sm:$0xff]   ;;  %s6510_s10 = smov 32   ;;  %s6511_s11 = smov [#allocation11]  }
  0x7a   :  { %3289 = vmatprep.subr.bf16.mxu1 %v5593_v35  ;;  %v6617_v32 = vld [vmem:[#allocation2 + $0x8] sm:$0xff]  ;;  %v5678_v34 = vld [vmem:[#allocation5 + $0x698] ss:$40 sps:$4 sm:$0xff]   ;;  %v5704_v49 = vld [vmem:[#allocation5 + $0x7dc] ss:$40 sps:$4 sm:$0xff]   ;;  %s4785_s12 = sshll.u32 %s6511_s11, 4  ;;  %s4786_s12 = int_to_ptr.vmem [resolvable:$true] %s4785_s12 }
  0x7b   :  { %v6621_v35 = vcombine.high %v6617_v32, %v6617_v32  ;;  %vm4776_vm2 = vcmask 261120   ;;  %s6471_s13 = scalar_lea.vmem %s4786_s12, 128  ;;  %p6476_p13 = scmp.lt.s32.totalorder %s4786_s12, %s4786_s12 }
  0x7c   :  { %3128 = vmatpush1.bf16.msra.mxu0 %v5594_v37  ;;  %v5686_v37 = vld [vmem:[#allocation5 + $0x6ec] ss:$40 sps:$4 sm:$0xff]   ;;  %p6472_p12 = scmp.ne.s32.totalorder %s4786_s12, %s6471_s13  ;;  %p6477_p0 = scmp.lt.s32.totalorder %s6471_s13, %s6471_s13 }
  0x7d   :  { %3290 = vmatpush1.bf16.msra.mxu1 %v5591_v36  ;;  %3129 = vmatprep.subr.bf16.mxu0 %v5595_v38  ;;  %v5683_v36 = vld [vmem:[#allocation5 + $0x734] ss:$40 sps:$4 sm:$0xff]   ;;  %v5681_v38 = vld [vmem:[#allocation5 + $0x730] ss:$40 sps:$4 sm:$0xff]  }
  0x7e   :  { %3291 = vmatprep.subr.bf16.mxu1 %v5599_v39  ;;  %v5684_v39 = vld [vmem:[#allocation5 + $0x6e8] ss:$40 sps:$4 sm:$0xff]   ;;  %p6478_p1 = por %p6477_p0, %p6476_p13 }
  0x80   :  { %3130 = vmatpush1.bf16.msra.mxu0 %v5600_v41  ;;  %v5692_v41 = vld [vmem:[#allocation5 + $0x73c] ss:$40 sps:$4 sm:$0xff]   ;;  %p6479_p2 = pnand %p6478_p1, %p6472_p12 }
  0x81   :  { %3292 = vmatpush1.bf16.msra.mxu1 %v5597_v40  ;;  %3131 = vmatprep.subr.bf16.mxu0 %v5601_v42  ;;  %v5689_v40 = vld [vmem:[#allocation5 + $0x784] ss:$40 sps:$4 sm:$0xff]   ;;  %v5687_v42 = vld [vmem:[#allocation5 + $0x780] ss:$40 sps:$4 sm:$0xff]  }
  0x82   :  { %3293 = vmatprep.subr.bf16.mxu1 %v5605_v43  ;;  %v5690_v43 = vld [vmem:[#allocation5 + $0x738] ss:$40 sps:$4 sm:$0xff]  }
  0x84   :  { %3132 = vmatpush1.bf16.msra.mxu0 %v5606_v45  ;;  %v5698_v45 = vld [vmem:[#allocation5 + $0x78c] ss:$40 sps:$4 sm:$0xff]  }
  0x85   :  { %3294 = vmatpush1.bf16.msra.mxu1 %v5603_v44  ;;  %3133 = vmatprep.subr.bf16.mxu0 %v5607_v46  ;;  %v5695_v44 = vld [vmem:[#allocation5 + $0x7d4] ss:$40 sps:$4 sm:$0xff]   ;;  %v5693_v46 = vld [vmem:[#allocation5 + $0x7d0] ss:$40 sps:$4 sm:$0xff]  }
  0x86   :  { %3295 = vmatprep.subr.bf16.mxu1 %v5611_v47  ;;  %v5696_v47 = vld [vmem:[#allocation5 + $0x788] ss:$40 sps:$4 sm:$0xff]  }
  0x88   :  { %3134 = vmatpush1.bf16.msra.mxu0 %v5612_v50  ;;  %v5699_v50 = vld [vmem:[#allocation5 + $0x820] ss:$40 sps:$4 sm:$0xff]  }
  0x89   :  { %3296 = vmatpush1.bf16.msra.mxu1 %v5609_v48  ;;  %3135 = vmatprep.subr.bf16.mxu0 %v5613_v51  ;;  %v5701_v48 = vld [vmem:[#allocation5 + $0x824] ss:$40 sps:$4 sm:$0xff]   ;;  %v5702_v51 = vld [vmem:[#allocation5 + $0x7d8] ss:$40 sps:$4 sm:$0xff]  }
  0x8a   :  { %3297 = vmatprep.subr.bf16.mxu1 %v5617_v53  ;;  %v5707_v53 = vld [vmem:[#allocation5 + $0x874] ss:$40 sps:$4 sm:$0xff]  }
  0x8c   :  { %3136 = vmatpush1.bf16.msra.mxu0 %v5618_v55  ;;  %v5705_v55 = vld [vmem:[#allocation5 + $0x870] ss:$40 sps:$4 sm:$0xff]  }
  0x8d   :  { %3298 = vmatpush1.bf16.msra.mxu1 %v5615_v54  ;;  %3137 = vmatprep.subr.bf16.mxu0 %v5619_v56  ;;  %v5710_v54 = vld [vmem:[#allocation5 + $0x82c] ss:$40 sps:$4 sm:$0xff]   ;;  %v5708_v56 = vld [vmem:[#allocation5 + $0x828] ss:$40 sps:$4 sm:$0xff]  }
  0x8e   :  { %3299 = vmatprep.subr.bf16.mxu1 %v5623_v57  ;;  %v5713_v57 = vld [vmem:[#allocation5 + $0x8c4] ss:$40 sps:$4 sm:$0xff]  }
  0x90   :  { %3138 = vmatpush1.bf16.msra.mxu0 %v5624_v59  ;;  %v5711_v59 = vld [vmem:[#allocation5 + $0x8c0] ss:$40 sps:$4 sm:$0xff]  }
  0x91   :  { %3300 = vmatpush1.bf16.msra.mxu1 %v5621_v58  ;;  %3139 = vmatprep.subr.bf16.mxu0 %v5625_v60  ;;  %v5716_v58 = vld [vmem:[#allocation5 + $0x87c] ss:$40 sps:$4 sm:$0xff]   ;;  %v5714_v60 = vld [vmem:[#allocation5 + $0x878] ss:$40 sps:$4 sm:$0xff]  }
  0x92   :  { %3301 = vmatprep.subr.bf16.mxu1 %v5629_v61  ;;  %v5719_v61 = vld [vmem:[#allocation5 + $0x914] ss:$40 sps:$4 sm:$0xff]  }
  0x94   :  { %3140 = vmatpush1.bf16.msra.mxu0 %v5630_v63  ;;  %v5717_v63 = vld [vmem:[#allocation5 + $0x910] ss:$40 sps:$4 sm:$0xff]  }
  0x95   :  { %3302 = vmatpush1.bf16.msra.mxu1 %v5627_v62  ;;  %3141 = vmatprep.subr.bf16.mxu0 %v5631_v1  ;;  %v5722_v62 = vld [vmem:[#allocation5 + $0x8cc] ss:$40 sps:$4 sm:$0xff]   ;;  %v5720_v1 = vld [vmem:[#allocation5 + $0x8c8] ss:$40 sps:$4 sm:$0xff]  }
  0x96   :  { %3303 = vmatprep.subr.bf16.mxu1 %v5635_v2  ;;  %v5725_v2 = vld [vmem:[#allocation5 + $0x964] ss:$40 sps:$4 sm:$0xff]  }
  0x98   :  { %3142 = vmatpush1.bf16.msra.mxu0 %v5636_v4  ;;  %v5723_v4 = vld [vmem:[#allocation5 + $0x960] ss:$40 sps:$4 sm:$0xff]  }
  0x99   :  { %3304 = vmatpush1.bf16.msra.mxu1 %v5633_v3  ;;  %3152 = vmatprep.subr.bf16.mxu0 %v5640_v5  ;;  %v5728_v3 = vld [vmem:[#allocation5 + $0x91c] ss:$40 sps:$4 sm:$0xff]   ;;  %v5726_v5 = vld [vmem:[#allocation5 + $0x918] ss:$40 sps:$4 sm:$0xff]  }
  0x9a   :  { %3305 = vmatprep.subr.bf16.mxu1 %v5643_v6  ;;  %v5731_v6 = vld [vmem:[#allocation5 + $0x9b4] ss:$40 sps:$4 sm:$0xff]  }
  0x9b   :  { %3144 = vmatmul.mubr.bf16.vlgmr.msra.gmra.mrb[0].mxu0 %v6613_v8 }
  0x9c   :  { %3153 = vmatpush1.bf16.msra.mxu0 %v5638_v7  ;;  %3184 = vmatprep.mubr.bf16.mxu0 %v6621_v35  ;;  %v5734_v7 = vld [vmem:[#allocation5 + $0x96c] ss:$40 sps:$4 sm:$0xff]  }
  0x9d   :  { %3306 = vmatpush1.bf16.msra.mxu1 %v5641_v9  ;;  %3154 = vmatprep.subr.bf16.mxu0 %v5647_v10  ;;  %v5729_v9 = vld [vmem:[#allocation5 + $0x9b0] ss:$40 sps:$4 sm:$0xff]  }
  0x9e   :  { %3316 = vmatprep.subr.bf16.mxu1 %v5650_v11  ;;  %v5732_v10 = vld [vmem:[#allocation5 + $0x968] ss:$40 sps:$4 sm:$0xff]   ;;  %v5738_v11 = vld [vmem:[#allocation5 + $0xa04] ss:$40 sps:$4 sm:$0xff]  }
  0xa0   :  { %3308 = vmatmul.mubr.bf16.vlgmr.msra.gmra.mrb[4].mxu1 %v6613_v8  ;;  %3155 = vmatpush1.bf16.msra.mxu0 %v5645_v12  ;;  %v5741_v12 = vld [vmem:[#allocation5 + $0x9bc] ss:$40 sps:$4 sm:$0xff]  }
  0xa1   :  { %3317 = vmatpush1.bf16.msra.mxu1 %v5648_v13  ;;  %3156 = vmatprep.subr.bf16.mxu0 %v5653_v14  ;;  %v5736_v13 = vld [vmem:[#allocation5 + $0xa00] ss:$40 sps:$4 sm:$0xff]  }
  0xa2   :  { %3318 = vmatprep.subr.bf16.mxu1 %v5656_v15  ;;  %3348 = vmatprep.mubr.bf16.mxu1 %v6621_v35  ;;  %v5739_v14 = vld [vmem:[#allocation5 + $0x9b8] ss:$40 sps:$4 sm:$0xff]   ;;  %v6627_v15 = vcombine.low %v6617_v32, %v6617_v32 }
  0xa3   :  { %v5761_v32 = vld [vmem:[#allocation5 + $0xb40] ss:$40 sps:$4 sm:$0xff]  }
  0xa4   :  { %3157 = vmatpush1.bf16.msra.mxu0 %v5651_v16  ;;  %v5745_v16 = vld [vmem:[#allocation5 + $0xa54] ss:$40 sps:$4 sm:$0xff]  }
  0xa5   :  { %3319 = vmatpush1.bf16.msra.mxu1 %v5654_v17  ;;  %3158 = vmatprep.subr.bf16.mxu0 %v5659_v18  ;;  %v5748_v17 = vld [vmem:[#allocation5 + $0xa0c] ss:$40 sps:$4 sm:$0xff]  }
  0xa6   :  { %3320 = vmatprep.subr.bf16.mxu1 %v5662_v19  ;;  %v6629_v18 = vld [vmem:[#allocation2 + $0x10] sm:$0xff] }
  0xa7   :  { %v6633_v19 = vcombine.high %v6629_v18, %v6629_v18 }
  0xa8   :  { %3159 = vmatpush1.bf16.msra.mxu0 %v5657_v20  ;;  %v5743_v20 = vld [vmem:[#allocation5 + $0xa50] ss:$40 sps:$4 sm:$0xff]  }
  0xa9   :  { %3321 = vmatpush1.bf16.msra.mxu1 %v5660_v21  ;;  %3160 = vmatprep.subr.bf16.mxu0 %v5665_v22  ;;  %v5746_v21 = vld [vmem:[#allocation5 + $0xa08] ss:$40 sps:$4 sm:$0xff]   ;;  %v5751_v22 = vld [vmem:[#allocation5 + $0xaa4] ss:$40 sps:$4 sm:$0xff]  }
  0xaa   :  { %3322 = vmatprep.subr.bf16.mxu1 %v5668_v23  ;;  %v5754_v23 = vld [vmem:[#allocation5 + $0xa5c] ss:$40 sps:$4 sm:$0xff]  }
  0xac   :  { %3161 = vmatpush1.bf16.msra.mxu0 %v5663_v24  ;;  %v5749_v24 = vld [vmem:[#allocation5 + $0xaa0] ss:$40 sps:$4 sm:$0xff]  }
  0xad   :  { %3323 = vmatpush1.bf16.msra.mxu1 %v5666_v25  ;;  %3162 = vmatprep.subr.bf16.mxu0 %v5671_v26  ;;  %v5752_v25 = vld [vmem:[#allocation5 + $0xa58] ss:$40 sps:$4 sm:$0xff]   ;;  %v5757_v26 = vld [vmem:[#allocation5 + $0xaf4] ss:$40 sps:$4 sm:$0xff]  }
  0xae   :  { %3324 = vmatprep.subr.bf16.mxu1 %v5674_v27  ;;  %v5760_v27 = vld [vmem:[#allocation5 + $0xaac] ss:$40 sps:$4 sm:$0xff]  }
  0xb0   :  { %3163 = vmatpush1.bf16.msra.mxu0 %v5669_v28  ;;  %v5755_v28 = vld [vmem:[#allocation5 + $0xaf0] ss:$40 sps:$4 sm:$0xff]  }
  0xb1   :  { %3325 = vmatpush1.bf16.msra.mxu1 %v5672_v29  ;;  %3164 = vmatprep.subr.bf16.mxu0 %v5677_v30  ;;  %v5758_v29 = vld [vmem:[#allocation5 + $0xaa8] ss:$40 sps:$4 sm:$0xff]   ;;  %v5763_v30 = vld [vmem:[#allocation5 + $0xb44] ss:$40 sps:$4 sm:$0xff]  }
  0xb2   :  { %3326 = vmatprep.subr.bf16.mxu1 %v5680_v31  ;;  %v5766_v31 = vld [vmem:[#allocation5 + $0xafc] ss:$40 sps:$4 sm:$0xff]  }
  0xb4   :  { %3165 = vmatpush1.bf16.msra.mxu0 %v5675_v33  ;;  %v5764_v33 = vld [vmem:[#allocation5 + $0xaf8] ss:$40 sps:$4 sm:$0xff]  }
  0xb5   :  { %3327 = vmatpush1.bf16.msra.mxu1 %v5678_v34  ;;  %3166 = vmatprep.subr.bf16.mxu0 %v5683_v36  ;;  %v5769_v34 = vld [vmem:[#allocation5 + $0xb94] ss:$40 sps:$4 sm:$0xff]  }
  0xb6   :  { %3328 = vmatprep.subr.bf16.mxu1 %v5686_v37  ;;  %v5772_v36 = vld [vmem:[#allocation5 + $0xb4c] ss:$40 sps:$4 sm:$0xff]   ;;  %v5767_v37 = vld [vmem:[#allocation5 + $0xb90] ss:$40 sps:$4 sm:$0xff]  }
  0xb8   :  { %3167 = vmatpush1.bf16.msra.mxu0 %v5681_v38  ;;  %v5770_v38 = vld [vmem:[#allocation5 + $0xb48] ss:$40 sps:$4 sm:$0xff]  }
  0xb9   :  { %3329 = vmatpush1.bf16.msra.mxu1 %v5684_v39  ;;  %3168 = vmatprep.subr.bf16.mxu0 %v5689_v40  ;;  %v5775_v39 = vld [vmem:[#allocation5 + $0xbe4] ss:$40 sps:$4 sm:$0xff]  }
  0xba   :  { %3330 = vmatprep.subr.bf16.mxu1 %v5692_v41  ;;  %v5778_v40 = vld [vmem:[#allocation5 + $0xb9c] ss:$40 sps:$4 sm:$0xff]   ;;  %v5773_v41 = vld [vmem:[#allocation5 + $0xbe0] ss:$40 sps:$4 sm:$0xff]  }
  0xbc   :  { %3169 = vmatpush1.bf16.msra.mxu0 %v5687_v42  ;;  %v5776_v42 = vld [vmem:[#allocation5 + $0xb98] ss:$40 sps:$4 sm:$0xff]  }
  0xbd   :  { %3331 = vmatpush1.bf16.msra.mxu1 %v5690_v43  ;;  %3170 = vmatprep.subr.bf16.mxu0 %v5695_v44  ;;  %v5781_v43 = vld [vmem:[#allocation5 + $0xc34] ss:$40 sps:$4 sm:$0xff]  }
  0xbe   :  { %3332 = vmatprep.subr.bf16.mxu1 %v5698_v45  ;;  %v5784_v44 = vld [vmem:[#allocation5 + $0xbec] ss:$40 sps:$4 sm:$0xff]   ;;  %v5779_v45 = vld [vmem:[#allocation5 + $0xc30] ss:$40 sps:$4 sm:$0xff]  }
  0xc0   :  { %3171 = vmatpush1.bf16.msra.mxu0 %v5693_v46  ;;  %v5782_v46 = vld [vmem:[#allocation5 + $0xbe8] ss:$40 sps:$4 sm:$0xff]  }
  0xc1   :  { %3333 = vmatpush1.bf16.msra.mxu1 %v5696_v47  ;;  %3172 = vmatprep.subr.bf16.mxu0 %v5701_v48  ;;  %v5787_v47 = vld [vmem:[#allocation5 + $0xc84] ss:$40 sps:$4 sm:$0xff]  }
  0xc2   :  { %3334 = vmatprep.subr.bf16.mxu1 %v5704_v49  ;;  %v5790_v48 = vld [vmem:[#allocation5 + $0xc3c] ss:$40 sps:$4 sm:$0xff]   ;;  %v5785_v49 = vld [vmem:[#allocation5 + $0xc80] ss:$40 sps:$4 sm:$0xff]  }
  0xc4   :  { %3173 = vmatpush1.bf16.msra.mxu0 %v5699_v50  ;;  %v5788_v50 = vld [vmem:[#allocation5 + $0xc38] ss:$40 sps:$4 sm:$0xff]  }
  0xc5   :  { %3335 = vmatpush1.bf16.msra.mxu1 %v5702_v51  ;;  %3174 = vmatprep.subr.bf16.mxu0 %v5707_v53  ;;  %v5793_v51 = vld [vmem:[#allocation5 + $0xcd4] ss:$40 sps:$4 sm:$0xff]  }
  0xc6   :  { %3336 = vmatprep.subr.bf16.mxu1 %v5710_v54  ;;  %v5796_v53 = vld [vmem:[#allocation5 + $0xc8c] ss:$40 sps:$4 sm:$0xff]   ;;  %v5791_v54 = vld [vmem:[#allocation5 + $0xcd0] ss:$40 sps:$4 sm:$0xff]  }
  0xc8   :  { %3175 = vmatpush1.bf16.msra.mxu0 %v5705_v55  ;;  %v5794_v55 = vld [vmem:[#allocation5 + $0xc88] ss:$40 sps:$4 sm:$0xff]  }
  0xc9   :  { %3337 = vmatpush1.bf16.msra.mxu1 %v5708_v56  ;;  %3176 = vmatprep.subr.bf16.mxu0 %v5713_v57  ;;  %v5799_v56 = vld [vmem:[#allocation5 + $0xd24] ss:$40 sps:$4 sm:$0xff]  }
  0xca   :  { %3338 = vmatprep.subr.bf16.mxu1 %v5716_v58  ;;  %v5802_v57 = vld [vmem:[#allocation5 + $0xcdc] ss:$40 sps:$4 sm:$0xff]   ;;  %v5797_v58 = vld [vmem:[#allocation5 + $0xd20] ss:$40 sps:$4 sm:$0xff]  }
  0xcc   :  { %3177 = vmatpush1.bf16.msra.mxu0 %v5711_v59  ;;  %v5800_v59 = vld [vmem:[#allocation5 + $0xcd8] ss:$40 sps:$4 sm:$0xff]  }
  0xcd   :  { %3339 = vmatpush1.bf16.msra.mxu1 %v5714_v60  ;;  %3178 = vmatprep.subr.bf16.mxu0 %v5719_v61  ;;  %v5805_v60 = vld [vmem:[#allocation5 + $0xd74] ss:$40 sps:$4 sm:$0xff]  }
  0xce   :  { %3340 = vmatprep.subr.bf16.mxu1 %v5722_v62  ;;  %v5808_v61 = vld [vmem:[#allocation5 + $0xd2c] ss:$40 sps:$4 sm:$0xff]   ;;  %v5803_v62 = vld [vmem:[#allocation5 + $0xd70] ss:$40 sps:$4 sm:$0xff]  }
  0xd0   :  { %3179 = vmatpush1.bf16.msra.mxu0 %v5717_v63  ;;  %v5806_v63 = vld [vmem:[#allocation5 + $0xd28] ss:$40 sps:$4 sm:$0xff]  }
  0xd1   :  { %3341 = vmatpush1.bf16.msra.mxu1 %v5720_v1  ;;  %3180 = vmatprep.subr.bf16.mxu0 %v5725_v2  ;;  %v5811_v1 = vld [vmem:[#allocation5 + $0xdc4] ss:$40 sps:$4 sm:$0xff]  }
  0xd2   :  { %3342 = vmatprep.subr.bf16.mxu1 %v5728_v3  ;;  %v5814_v2 = vld [vmem:[#allocation5 + $0xd7c] ss:$40 sps:$4 sm:$0xff]   ;;  %v5809_v3 = vld [vmem:[#allocation5 + $0xdc0] ss:$40 sps:$4 sm:$0xff]  }
  0xd4   :  { %3181 = vmatpush1.bf16.msra.mxu0 %v5723_v4  ;;  %v5812_v4 = vld [vmem:[#allocation5 + $0xd78] ss:$40 sps:$4 sm:$0xff]  }
  0xd5   :  { %3343 = vmatpush1.bf16.msra.mxu1 %v5726_v5  ;;  %3182 = vmatprep.subr.bf16.mxu0 %v5731_v6  ;;  %v5817_v5 = vld [vmem:[#allocation5 + $0xe14] ss:$40 sps:$4 sm:$0xff]  }
  0xd6   :  { %3344 = vmatprep.subr.bf16.mxu1 %v5734_v7  ;;  %v5820_v6 = vld [vmem:[#allocation5 + $0xdcc] ss:$40 sps:$4 sm:$0xff]   ;;  %v5815_v7 = vld [vmem:[#allocation5 + $0xe10] ss:$40 sps:$4 sm:$0xff]  }
  0xd8   :  { %3183 = vmatpush1.bf16.msra.mxu0 %v5729_v9  ;;  %v5818_v9 = vld [vmem:[#allocation5 + $0xdc8] ss:$40 sps:$4 sm:$0xff]  }
  0xd9   :  { %3345 = vmatpush1.bf16.msra.mxu1 %v5732_v10  ;;  %3193 = vmatprep.subr.bf16.mxu0 %v5738_v11  ;;  %v5823_v10 = vld [vmem:[#allocation5 + $0xe64] ss:$40 sps:$4 sm:$0xff]  }
  0xda   :  { %3346 = vmatprep.subr.bf16.mxu1 %v5741_v12  ;;  %v5826_v11 = vld [vmem:[#allocation5 + $0xe1c] ss:$40 sps:$4 sm:$0xff]   ;;  %v5821_v12 = vld [vmem:[#allocation5 + $0xe60] ss:$40 sps:$4 sm:$0xff]  }
  0xdb   :  { %3185 = vmatmul.mubr.bf16.vlgmr.msra.gmra.mrb[0].mxu0 %v6627_v15 }
  0xdc   :  { %3194 = vmatpush1.bf16.msra.mxu0 %v5736_v13  ;;  %3225 = vmatprep.mubr.bf16.mxu0 %v6633_v19  ;;  %v5824_v13 = vld [vmem:[#allocation5 + $0xe18] ss:$40 sps:$4 sm:$0xff]  }
  0xdd   :  { %3347 = vmatpush1.bf16.msra.mxu1 %v5739_v14  ;;  %3195 = vmatprep.subr.bf16.mxu0 %v5745_v16  ;;  %v5829_v14 = vld [vmem:[#allocation5 + $0xeb4] ss:$40 sps:$4 sm:$0xff]  }
  0xde   :  { %3357 = vmatprep.subr.bf16.mxu1 %v5748_v17  ;;  %v5832_v16 = vld [vmem:[#allocation5 + $0xe6c] ss:$40 sps:$4 sm:$0xff]   ;;  %v5827_v17 = vld [vmem:[#allocation5 + $0xeb0] ss:$40 sps:$4 sm:$0xff]  }
  0xe0   :  { %3349 = vmatmul.mubr.bf16.vlgmr.msra.gmra.mrb[4].mxu1 %v6627_v15  ;;  %3196 = vmatpush1.bf16.msra.mxu0 %v5743_v20  ;;  %v5830_v20 = vld [vmem:[#allocation5 + $0xe68] ss:$40 sps:$4 sm:$0xff]  }
  0xe1   :  { %3358 = vmatpush1.bf16.msra.mxu1 %v5746_v21  ;;  %3197 = vmatprep.subr.bf16.mxu0 %v5751_v22  ;;  %v5837_v21 = vld [vmem:[#allocation5 + $0xebc] ss:$40 sps:$4 sm:$0xff]  }
  0xe2   :  { %3359 = vmatprep.subr.bf16.mxu1 %v5754_v23  ;;  %3389 = vmatprep.mubr.bf16.mxu1 %v6633_v19  ;;  %v5840_v22 = vld [vmem:[#allocation5 + $0x14] ss:$40 sps:$4 sm:$0xff]   ;;  %v6641_v23 = vcombine.low %v6629_v18, %v6629_v18  ;;  %v5844_v18 = vld [vmem:[#allocation5 + $0xb0] ss:$40 sps:$4 sm:$0xff]  }
  0xe4   :  { %3198 = vmatpush1.bf16.msra.mxu0 %v5749_v24  ;;  %v5835_v24 = vld [vmem:[#allocation5 + $0xeb8] ss:$40 sps:$4 sm:$0xff]  }
  0xe5   :  { %3360 = vmatpush1.bf16.msra.mxu1 %v5752_v25  ;;  %3199 = vmatprep.subr.bf16.mxu0 %v5757_v26  ;;  %v5838_v25 = vld [vmem:[#allocation5 + $0x10] ss:$40 sps:$4 sm:$0xff]   ;;  %v5843_v26 = vld [vmem:[#allocation5 + $0x64] ss:$40 sps:$4 sm:$0xff]  }
  0xe6   :  { %3361 = vmatprep.subr.bf16.mxu1 %v5760_v27  ;;  %v5849_v27 = vld [vmem:[#allocation5 + $0xf0c] ss:$40 sps:$4 sm:$0xff]  }
  0xe8   :  { %3200 = vmatpush1.bf16.msra.mxu0 %v5755_v28  ;;  %v5841_v28 = vld [vmem:[#allocation5 + $0x60] ss:$40 sps:$4 sm:$0xff]  }
  0xe9   :  { %3362 = vmatpush1.bf16.msra.mxu1 %v5758_v29  ;;  %3201 = vmatprep.subr.bf16.mxu0 %v5763_v30  ;;  %v5847_v29 = vld [vmem:[#allocation5 + $0xf08] ss:$40 sps:$4 sm:$0xff]   ;;  %v5846_v30 = vld [vmem:[#allocation5 + $0xb4] ss:$40 sps:$4 sm:$0xff]  }
  0xea   :  { %3363 = vmatprep.subr.bf16.mxu1 %v5766_v31  ;;  %v5858_v31 = vld [vmem:[#allocation5 + $0xf14] ss:$40 sps:$4 sm:$0xff]  }
  0xec   :  { %3202 = vmatpush1.bf16.msra.mxu0 %v5761_v32  ;;  %v5852_v32 = vld [vmem:[#allocation5 + $0x104] ss:$40 sps:$4 sm:$0xff]  }
  0xed   :  { %3364 = vmatpush1.bf16.msra.mxu1 %v5764_v33  ;;  %3203 = vmatprep.subr.bf16.mxu0 %v5769_v34  ;;  %v5850_v33 = vld [vmem:[#allocation5 + $0x100] ss:$40 sps:$4 sm:$0xff]   ;;  %v5855_v34 = vld [vmem:[#allocation5 + $0x154] ss:$40 sps:$4 sm:$0xff]  }
  0xee   :  { %3365 = vmatprep.subr.bf16.mxu1 %v5772_v36  ;;  %v5853_v36 = vld [vmem:[#allocation5 + $0x150] ss:$40 sps:$4 sm:$0xff]  }
  0xf0   :  { %3204 = vmatpush1.bf16.msra.mxu0 %v5767_v37  ;;  %v5856_v37 = vld [vmem:[#allocation5 + $0xf10] ss:$40 sps:$4 sm:$0xff]  }
  0xf1   :  { %3366 = vmatpush1.bf16.msra.mxu1 %v5770_v38  ;;  %3205 = vmatprep.subr.bf16.mxu0 %v5775_v39  ;;  %v5861_v38 = vld [vmem:[#allocation5 + $0x1a4] ss:$40 sps:$4 sm:$0xff]  }
  0xf2   :  { %3367 = vmatprep.subr.bf16.mxu1 %v5778_v40  ;;  %v5864_v39 = vld [vmem:[#allocation5 + $0x1c] ss:$40 sps:$4 sm:$0xff]  }
  0xf3   :  { %v6359_v40 = vld [vmem:[#allocation2 + $0x18] ss:$0 sps:$4 sm:$0xff]  }
  0xf4   :  { %3206 = vmatpush1.bf16.msra.mxu0 %v5773_v41  ;;  %v5859_v41 = vld [vmem:[#allocation5 + $0x1a0] ss:$40 sps:$4 sm:$0xff]  }
  0xf5   :  { %3368 = vmatpush1.bf16.msra.mxu1 %v5776_v42  ;;  %3207 = vmatprep.subr.bf16.mxu0 %v5781_v43  ;;  %v5867_v42 = vld [vmem:[#allocation5 + $0x1f4] ss:$40 sps:$4 sm:$0xff]   ;;  %v5862_v43 = vld [vmem:[#allocation5 + $0x18] ss:$40 sps:$4 sm:$0xff]  }
  0xf6   :  { %3369 = vmatprep.subr.bf16.mxu1 %v5784_v44  ;;  %v5865_v44 = vld [vmem:[#allocation5 + $0x1f0] ss:$40 sps:$4 sm:$0xff]  }
  0xf8   :  { %3208 = vmatpush1.bf16.msra.mxu0 %v5779_v45  ;;  %v5870_v45 = vld [vmem:[#allocation5 + $0x6c] ss:$40 sps:$4 sm:$0xff]  }
  0xf9   :  { %3370 = vmatpush1.bf16.msra.mxu1 %v5782_v46  ;;  %3209 = vmatprep.subr.bf16.mxu0 %v5787_v47  ;;  %v5873_v46 = vld [vmem:[#allocation5 + $0x244] ss:$40 sps:$4 sm:$0xff]  }
  0xfa   :  { %3371 = vmatprep.subr.bf16.mxu1 %v5790_v48  ;;  %v5868_v48 = vld [vmem:[#allocation5 + $0x68] ss:$40 sps:$4 sm:$0xff]  }
  0xfc   :  { %3210 = vmatpush1.bf16.msra.mxu0 %v5785_v49 }
  0xfd   :  { %3372 = vmatpush1.bf16.msra.mxu1 %v5788_v50  ;;  %3211 = vmatprep.subr.bf16.mxu0 %v5793_v51  ;;  %v5871_v50 = vld [vmem:[#allocation5 + $0x240] ss:$40 sps:$4 sm:$0xff]  }
  0xfe   :  { %3373 = vmatprep.subr.bf16.mxu1 %v5796_v53  ;;  %v5876_v53 = vld [vmem:[#allocation5 + $0xbc] ss:$40 sps:$4 sm:$0xff]  }
 0x100   :  { %3212 = vmatpush1.bf16.msra.mxu0 %v5791_v54  ;;  %v5879_v54 = vld [vmem:[#allocation5 + $0x294] ss:$40 sps:$4 sm:$0xff]  }
 0x101   :  { %3374 = vmatpush1.bf16.msra.mxu1 %v5794_v55  ;;  %3213 = vmatprep.subr.bf16.mxu0 %v5799_v56  ;;  %v5874_v56 = vld [vmem:[#allocation5 + $0xb8] ss:$40 sps:$4 sm:$0xff]  }
 0x102   :  { %3375 = vmatprep.subr.bf16.mxu1 %v5802_v57  ;;  %v5877_v57 = vld [vmem:[#allocation5 + $0x290] ss:$40 sps:$4 sm:$0xff]  }
 0x104   :  { %3214 = vmatpush1.bf16.msra.mxu0 %v5797_v58  ;;  %v5882_v58 = vld [vmem:[#allocation5 + $0x10c] ss:$40 sps:$4 sm:$0xff]  }
 0x105   :  { %3376 = vmatpush1.bf16.msra.mxu1 %v5800_v59  ;;  %3215 = vmatprep.subr.bf16.mxu0 %v5805_v60  ;;  %v5885_v59 = vld [vmem:[#allocation5 + $0x2e4] ss:$40 sps:$4 sm:$0xff]   ;;  %v5880_v60 = vld [vmem:[#allocation5 + $0x108] ss:$40 sps:$4 sm:$0xff]  }
 0x106   :  { %3377 = vmatprep.subr.bf16.mxu1 %v5808_v61  ;;  %v5883_v61 = vld [vmem:[#allocation5 + $0x2e0] ss:$40 sps:$4 sm:$0xff]  }
 0x108   :  { %3216 = vmatpush1.bf16.msra.mxu0 %v5803_v62  ;;  %v5888_v62 = vld [vmem:[#allocation5 + $0x15c] ss:$40 sps:$4 sm:$0xff]  }
 0x109   :  { %3378 = vmatpush1.bf16.msra.mxu1 %v5806_v63  ;;  %3217 = vmatprep.subr.bf16.mxu0 %v5811_v1  ;;  %v5891_v63 = vld [vmem:[#allocation5 + $0x334] ss:$40 sps:$4 sm:$0xff]   ;;  %v5886_v1 = vld [vmem:[#allocation5 + $0x158] ss:$40 sps:$4 sm:$0xff]  }
 0x10a   :  { %3379 = vmatprep.subr.bf16.mxu1 %v5814_v2  ;;  %v5889_v2 = vld [vmem:[#allocation5 + $0x330] ss:$40 sps:$4 sm:$0xff]  }
 0x10c   :  { %3218 = vmatpush1.bf16.msra.mxu0 %v5809_v3  ;;  %v5894_v3 = vld [vmem:[#allocation5 + $0x1ac] ss:$40 sps:$4 sm:$0xff]  }
 0x10d   :  { %3380 = vmatpush1.bf16.msra.mxu1 %v5812_v4  ;;  %3219 = vmatprep.subr.bf16.mxu0 %v5817_v5  ;;  %v5897_v4 = vld [vmem:[#allocation5 + $0x384] ss:$40 sps:$4 sm:$0xff]   ;;  %v5892_v5 = vld [vmem:[#allocation5 + $0x1a8] ss:$40 sps:$4 sm:$0xff]  }
 0x10e   :  { %3381 = vmatprep.subr.bf16.mxu1 %v5820_v6  ;;  %v5895_v6 = vld [vmem:[#allocation5 + $0x380] ss:$40 sps:$4 sm:$0xff]  }
 0x110   :  { %3220 = vmatpush1.bf16.msra.mxu0 %v5815_v7  ;;  %v5900_v7 = vld [vmem:[#allocation5 + $0x1fc] ss:$40 sps:$4 sm:$0xff]  }
 0x111   :  { %3382 = vmatpush1.bf16.msra.mxu1 %v5818_v9  ;;  %3221 = vmatprep.subr.bf16.mxu0 %v5823_v10  ;;  %v5903_v9 = vld [vmem:[#allocation5 + $0x3d4] ss:$40 sps:$4 sm:$0xff]   ;;  %v5898_v10 = vld [vmem:[#allocation5 + $0x1f8] ss:$40 sps:$4 sm:$0xff]  }
 0x112   :  { %3383 = vmatprep.subr.bf16.mxu1 %v5826_v11  ;;  %v5901_v11 = vld [vmem:[#allocation5 + $0x3d0] ss:$40 sps:$4 sm:$0xff]  }
 0x114   :  { %3222 = vmatpush1.bf16.msra.mxu0 %v5821_v12  ;;  %v5906_v12 = vld [vmem:[#allocation5 + $0x24c] ss:$40 sps:$4 sm:$0xff]  }
 0x115   :  { %3384 = vmatpush1.bf16.msra.mxu1 %v5824_v13  ;;  %3223 = vmatprep.subr.bf16.mxu0 %v5829_v14  ;;  %v5909_v13 = vld [vmem:[#allocation5 + $0x424] ss:$40 sps:$4 sm:$0xff]   ;;  %v5904_v14 = vld [vmem:[#allocation5 + $0x248] ss:$40 sps:$4 sm:$0xff]  }
 0x116   :  { %3385 = vmatprep.subr.bf16.mxu1 %v5832_v16  ;;  %v5907_v16 = vld [vmem:[#allocation5 + $0x420] ss:$40 sps:$4 sm:$0xff]  }
 0x118   :  { %3224 = vmatpush1.bf16.msra.mxu0 %v5827_v17  ;;  %v5912_v17 = vld [vmem:[#allocation5 + $0x29c] ss:$40 sps:$4 sm:$0xff]  }
 0x119   :  { %3386 = vmatpush1.bf16.msra.mxu1 %v5830_v20  ;;  %3439 = vmatprep.subr.bf16.mxu0 %v5840_v22  ;;  %v5915_v20 = vld [vmem:[#allocation5 + $0x474] ss:$40 sps:$4 sm:$0xff]   ;;  %v5913_v22 = vld [vmem:[#allocation5 + $0x470] ss:$40 sps:$4 sm:$0xff]  }
 0x11a   :  { %3387 = vmatprep.subr.bf16.mxu1 %v5837_v21  ;;  %v5910_v21 = vld [vmem:[#allocation5 + $0x298] ss:$40 sps:$4 sm:$0xff]  }
 0x11b   :  { %3226 = vmatmul.mubr.bf16.vlgmr.msra.gmra.mrb[0].mxu0 %v6641_v23 }
 0x11c   :  { %3440 = vmatpush1.bf16.msra.mxu0 %v5838_v25  ;;  %3471 = vmatprep.mubr.bf16.mxu0 %v6609_v52  ;;  %v5921_v25 = vld [vmem:[#allocation5 + $0x4c4] ss:$40 sps:$4 sm:$0xff]  }
 0x11d   :  { %3388 = vmatpush1.bf16.msra.mxu1 %v5835_v24  ;;  %3441 = vmatprep.subr.bf16.mxu0 %v5843_v26  ;;  %v5918_v24 = vld [vmem:[#allocation5 + $0x2ec] ss:$40 sps:$4 sm:$0xff]   ;;  %v5916_v26 = vld [vmem:[#allocation5 + $0x2e8] ss:$40 sps:$4 sm:$0xff]  }
 0x11e   :  { %3398 = vmatprep.subr.bf16.mxu1 %v5849_v27  ;;  %v5919_v27 = vld [vmem:[#allocation5 + $0x4c0] ss:$40 sps:$4 sm:$0xff]  }
 0x120   :  { %3390 = vmatmul.mubr.bf16.vlgmr.msra.gmra.mrb[4].mxu1 %v6641_v23  ;;  %3442 = vmatpush1.bf16.msra.mxu0 %v5841_v28  ;;  %v5924_v28 = vld [vmem:[#allocation5 + $0x33c] ss:$40 sps:$4 sm:$0xff]  }
 0x121   :  { %3399 = vmatpush1.bf16.msra.mxu1 %v5847_v29  ;;  %3443 = vmatprep.subr.bf16.mxu0 %v5846_v30  ;;  %v5927_v29 = vld [vmem:[#allocation5 + $0x514] ss:$40 sps:$4 sm:$0xff]   ;;  %v5922_v30 = vld [vmem:[#allocation5 + $0x338] ss:$40 sps:$4 sm:$0xff]  }
 0x122   :  { %3430 = vmatprep.mubr.bf16.mxu1 %v6508_v0  ;;  %3562 = vmatprep.subr.bf16.mxu1 %v5858_v31  ;;  %v5925_v31 = vld [vmem:[#allocation5 + $0x510] ss:$40 sps:$4 sm:$0xff]  }
 0x124   :  { %3444 = vmatpush1.bf16.msra.mxu0 %v5844_v18  ;;  %v5930_v18 = vld [vmem:[#allocation5 + $0x38c] ss:$40 sps:$4 sm:$0xff]  }
 0x125   :  { %3445 = vmatprep.subr.bf16.mxu0 %v5852_v32  ;;  %v5933_v32 = vld [vmem:[#allocation5 + $0x564] ss:$40 sps:$4 sm:$0xff]  }
 0x128   :  { %3446 = vmatpush1.bf16.msra.mxu0 %v5850_v33  ;;  %v5928_v33 = vld [vmem:[#allocation5 + $0x388] ss:$40 sps:$4 sm:$0xff]  }
 0x129   :  { %3447 = vmatprep.subr.bf16.mxu0 %v5855_v34  ;;  %v5931_v34 = vld [vmem:[#allocation5 + $0x560] ss:$40 sps:$4 sm:$0xff]  }
 0x12c   :  { %5294 = vmatmul.mubr.msk.bf16.vlgmr.msra.gmra.mrb[4].mxu1 %vm3107_vm0, %v6359_v40  ;;  %3448 = vmatpush1.bf16.msra.mxu0 %v5853_v36  ;;  %v5936_v36 = vld [vmem:[#allocation5 + $0x3dc] ss:$40 sps:$4 sm:$0xff]  }
 0x12d   :  { %3563 = vmatpush1.bf16.msra.mxu1 %v5856_v37  ;;  %3449 = vmatprep.subr.bf16.mxu0 %v5861_v38  ;;  %v5939_v37 = vld [vmem:[#allocation5 + $0x5b4] ss:$40 sps:$4 sm:$0xff]   ;;  %v5934_v38 = vld [vmem:[#allocation5 + $0x3d8] ss:$40 sps:$4 sm:$0xff]  }
 0x12e   :  { %3594 = vmatprep.mubr.bf16.mxu1 %v6508_v0  ;;  %3603 = vmatprep.subr.bf16.mxu1 %v5864_v39  ;;  %v5937_v39 = vld [vmem:[#allocation5 + $0x5b0] ss:$40 sps:$4 sm:$0xff]  }
 0x130   :  { %3450 = vmatpush1.bf16.msra.mxu0 %v5859_v41  ;;  %v5945_v41 = vld [vmem:[#allocation5 + $0x604] ss:$40 sps:$4 sm:$0xff]  }
 0x131   :  { %3451 = vmatprep.subr.bf16.mxu0 %v5867_v42  ;;  %v5940_v42 = vld [vmem:[#allocation5 + $0x428] ss:$40 sps:$4 sm:$0xff]  }
 0x133   :  { %v6649_v47 = vpop.f32.mrb[0].mxu1 }
 0x134   :  { %5295 = vmatmul.mubr.msk.bf16.vlgmr.msra.gmra.mrb[8].mxu1 %vm3107_vm0, %v6359_v40  ;;  %v6652_v49 = vpop.f32.mrb[1].mxu1  ;;  %3452 = vmatpush1.bf16.msra.mxu0 %v5865_v44  ;;  %v5942_v40 = vld [vmem:[#allocation5 + $0x42c] ss:$40 sps:$4 sm:$0xff]   ;;  %v5948_v44 = vld [vmem:[#allocation5 + $0x47c] ss:$40 sps:$4 sm:$0xff]  }
 0x135   :  { %3604 = vmatpush1.bf16.msra.mxu1 %v5862_v43  ;;  %v3272_v51 = vpop.f32.mrb[2].mxu1  ;;  %3453 = vmatprep.subr.bf16.mxu0 %v5873_v46  ;;  %v5943_v43 = vld [vmem:[#allocation5 + $0x600] ss:$40 sps:$4 sm:$0xff]  }
 0x136   :  { %3605 = vmatprep.subr.bf16.mxu1 %v5870_v45  ;;  %v3273_v55 = vpop.f32.mrb[3].mxu1  ;;  %3635 = vmatprep.mubr.bf16.mxu1 %v6609_v52  ;;  %v5951_v45 = vld [vmem:[#allocation5 + $0x654] ss:$40 sps:$4 sm:$0xff]   ;;  %v5946_v46 = vld [vmem:[#allocation5 + $0x478] ss:$40 sps:$4 sm:$0xff]  }
 0x137   :  { %v5957_v51 = vld [vmem:[#allocation5 + $0x6a4] ss:$40 sps:$4 sm:$0xff]  }
 0x138   :  { %3454 = vmatpush1.bf16.msra.mxu0 %v5871_v50  ;;  %v5954_v50 = vld [vmem:[#allocation5 + $0x4cc] ss:$40 sps:$4 sm:$0xff]   ;;  %v5960_v55 = vld [vmem:[#allocation5 + $0x51c] ss:$40 sps:$4 sm:$0xff]  }
 0x139   :  { %3606 = vmatpush1.bf16.msra.mxu1 %v5868_v48  ;;  %3455 = vmatprep.subr.bf16.mxu0 %v5879_v54  ;;  %v5949_v48 = vld [vmem:[#allocation5 + $0x650] ss:$40 sps:$4 sm:$0xff]   ;;  %v5955_v54 = vld [vmem:[#allocation5 + $0x6a0] ss:$40 sps:$4 sm:$0xff]  }
 0x13a   :  { %3607 = vmatprep.subr.bf16.mxu1 %v5876_v53  ;;  %v5952_v53 = vld [vmem:[#allocation5 + $0x4c8] ss:$40 sps:$4 sm:$0xff]  }
 0x13c   :  { %3456 = vmatpush1.bf16.msra.mxu0 %v5877_v57  ;;  %v5958_v57 = vld [vmem:[#allocation5 + $0x518] ss:$40 sps:$4 sm:$0xff]  }
 0x13d   :  { %3608 = vmatpush1.bf16.msra.mxu1 %v5874_v56  ;;  %3457 = vmatprep.subr.bf16.mxu0 %v5885_v59  ;;  %v5963_v56 = vld [vmem:[#allocation5 + $0x6f4] ss:$40 sps:$4 sm:$0xff]  }
 0x13e   :  { %3609 = vmatprep.subr.bf16.mxu1 %v5882_v58  ;;  %v5961_v58 = vld [vmem:[#allocation5 + $0x6f0] ss:$40 sps:$4 sm:$0xff]   ;;  %v5966_v59 = vld [vmem:[#allocation5 + $0x56c] ss:$40 sps:$4 sm:$0xff]  }
 0x140   :  { %3458 = vmatpush1.bf16.msra.mxu0 %v5883_v61  ;;  %v5964_v61 = vld [vmem:[#allocation5 + $0x568] ss:$40 sps:$4 sm:$0xff]  }
 0x141   :  { %3610 = vmatpush1.bf16.msra.mxu1 %v5880_v60  ;;  %3459 = vmatprep.subr.bf16.mxu0 %v5891_v63  ;;  %v5969_v60 = vld [vmem:[#allocation5 + $0x744] ss:$40 sps:$4 sm:$0xff]  }
 0x142   :  { %3611 = vmatprep.subr.bf16.mxu1 %v5888_v62  ;;  %v5967_v62 = vld [vmem:[#allocation5 + $0x740] ss:$40 sps:$4 sm:$0xff]   ;;  %v5972_v63 = vld [vmem:[#allocation5 + $0x5bc] ss:$40 sps:$4 sm:$0xff]  }
 0x144   :  { %3460 = vmatpush1.bf16.msra.mxu0 %v5889_v2  ;;  %v5970_v2 = vld [vmem:[#allocation5 + $0x5b8] ss:$40 sps:$4 sm:$0xff]  }
 0x145   :  { %3612 = vmatpush1.bf16.msra.mxu1 %v5886_v1  ;;  %3461 = vmatprep.subr.bf16.mxu0 %v5897_v4  ;;  %v5975_v1 = vld [vmem:[#allocation5 + $0x794] ss:$40 sps:$4 sm:$0xff]  }
 0x146   :  { %3613 = vmatprep.subr.bf16.mxu1 %v5894_v3  ;;  %v5973_v3 = vld [vmem:[#allocation5 + $0x790] ss:$40 sps:$4 sm:$0xff]   ;;  %v5978_v4 = vld [vmem:[#allocation5 + $0x60c] ss:$40 sps:$4 sm:$0xff]  }
 0x148   :  { %3462 = vmatpush1.bf16.msra.mxu0 %v5895_v6  ;;  %v5976_v6 = vld [vmem:[#allocation5 + $0x608] ss:$40 sps:$4 sm:$0xff]  }
 0x149   :  { %3614 = vmatpush1.bf16.msra.mxu1 %v5892_v5  ;;  %3463 = vmatprep.subr.bf16.mxu0 %v5903_v9  ;;  %v5981_v5 = vld [vmem:[#allocation5 + $0x7e4] ss:$40 sps:$4 sm:$0xff]  }
 0x14a   :  { %3615 = vmatprep.subr.bf16.mxu1 %v5900_v7  ;;  %v5979_v7 = vld [vmem:[#allocation5 + $0x7e0] ss:$40 sps:$4 sm:$0xff]   ;;  %v5984_v9 = vld [vmem:[#allocation5 + $0x65c] ss:$40 sps:$4 sm:$0xff]  }
 0x14c   :  { %3464 = vmatpush1.bf16.msra.mxu0 %v5901_v11  ;;  %v5982_v11 = vld [vmem:[#allocation5 + $0x658] ss:$40 sps:$4 sm:$0xff]  }
 0x14d   :  { %3616 = vmatpush1.bf16.msra.mxu1 %v5898_v10  ;;  %3465 = vmatprep.subr.bf16.mxu0 %v5909_v13  ;;  %v5987_v10 = vld [vmem:[#allocation5 + $0x834] ss:$40 sps:$4 sm:$0xff]  }
 0x14e   :  { %3617 = vmatprep.subr.bf16.mxu1 %v5906_v12  ;;  %v5985_v12 = vld [vmem:[#allocation5 + $0x830] ss:$40 sps:$4 sm:$0xff]   ;;  %v5990_v13 = vld [vmem:[#allocation5 + $0x6ac] ss:$40 sps:$4 sm:$0xff]  }
 0x150   :  { %3466 = vmatpush1.bf16.msra.mxu0 %v5907_v16  ;;  %v5988_v16 = vld [vmem:[#allocation5 + $0x6a8] ss:$40 sps:$4 sm:$0xff]  }
 0x151   :  { %3618 = vmatpush1.bf16.msra.mxu1 %v5904_v14  ;;  %3467 = vmatprep.subr.bf16.mxu0 %v5915_v20  ;;  %v5993_v14 = vld [vmem:[#allocation5 + $0x884] ss:$40 sps:$4 sm:$0xff]  }
 0x152   :  { %3619 = vmatprep.subr.bf16.mxu1 %v5912_v17  ;;  %v5991_v17 = vld [vmem:[#allocation5 + $0x880] ss:$40 sps:$4 sm:$0xff]   ;;  %v5996_v20 = vld [vmem:[#allocation5 + $0x6fc] ss:$40 sps:$4 sm:$0xff]  }
 0x154   :  { %3468 = vmatpush1.bf16.msra.mxu0 %v5913_v22  ;;  %v5994_v22 = vld [vmem:[#allocation5 + $0x6f8] ss:$40 sps:$4 sm:$0xff]  }
 0x155   :  { %3620 = vmatpush1.bf16.msra.mxu1 %v5910_v21  ;;  %3469 = vmatprep.subr.bf16.mxu0 %v5921_v25  ;;  %v5999_v21 = vld [vmem:[#allocation5 + $0x8d4] ss:$40 sps:$4 sm:$0xff]  }
 0x156   :  { %3621 = vmatprep.subr.bf16.mxu1 %v5918_v24  ;;  %v5997_v24 = vld [vmem:[#allocation5 + $0x8d0] ss:$40 sps:$4 sm:$0xff]   ;;  %v6002_v25 = vld [vmem:[#allocation5 + $0x74c] ss:$40 sps:$4 sm:$0xff]  }
 0x158   :  { %3470 = vmatpush1.bf16.msra.mxu0 %v5919_v27  ;;  %v6000_v27 = vld [vmem:[#allocation5 + $0x748] ss:$40 sps:$4 sm:$0xff]  }
 0x159   :  { %3622 = vmatpush1.bf16.msra.mxu1 %v5916_v26  ;;  %3480 = vmatprep.subr.bf16.mxu0 %v5927_v29  ;;  %v6005_v26 = vld [vmem:[#allocation5 + $0x924] ss:$40 sps:$4 sm:$0xff]  }
 0x15a   :  { %3623 = vmatprep.subr.bf16.mxu1 %v5924_v28  ;;  %v6003_v28 = vld [vmem:[#allocation5 + $0x920] ss:$40 sps:$4 sm:$0xff]   ;;  %v6008_v29 = vld [vmem:[#allocation5 + $0x79c] ss:$40 sps:$4 sm:$0xff]  }
 0x15b   :  { %3472 = vmatmul.mubr.bf16.vlgmr.msra.gmra.mrb[4].mxu0 %v6613_v8 }
 0x15c   :  { %3481 = vmatpush1.bf16.msra.mxu0 %v5925_v31  ;;  %3512 = vmatprep.mubr.bf16.mxu0 %v6621_v35  ;;  %v6006_v31 = vld [vmem:[#allocation5 + $0x798] ss:$40 sps:$4 sm:$0xff]  }
 0x15d   :  { %3624 = vmatpush1.bf16.msra.mxu1 %v5922_v30  ;;  %3482 = vmatprep.subr.bf16.mxu0 %v5933_v32  ;;  %v6011_v30 = vld [vmem:[#allocation5 + $0x974] ss:$40 sps:$4 sm:$0xff]  }
 0x15e   :  { %3625 = vmatprep.subr.bf16.mxu1 %v5930_v18  ;;  %v6009_v18 = vld [vmem:[#allocation5 + $0x970] ss:$40 sps:$4 sm:$0xff]   ;;  %v6014_v32 = vld [vmem:[#allocation5 + $0x7ec] ss:$40 sps:$4 sm:$0xff]  }
 0x160   :  { %3483 = vmatpush1.bf16.msra.mxu0 %v5931_v34  ;;  %v6012_v34 = vld [vmem:[#allocation5 + $0x7e8] ss:$40 sps:$4 sm:$0xff]  }
 0x161   :  { %3626 = vmatpush1.bf16.msra.mxu1 %v5928_v33  ;;  %3484 = vmatprep.subr.bf16.mxu0 %v5939_v37  ;;  %v6017_v33 = vld [vmem:[#allocation5 + $0x9c4] ss:$40 sps:$4 sm:$0xff]  }
 0x162   :  { %3627 = vmatprep.subr.bf16.mxu1 %v5936_v36  ;;  %v6015_v36 = vld [vmem:[#allocation5 + $0x9c0] ss:$40 sps:$4 sm:$0xff]   ;;  %v6020_v37 = vld [vmem:[#allocation5 + $0x83c] ss:$40 sps:$4 sm:$0xff]  }
 0x164   :  { %3485 = vmatpush1.bf16.msra.mxu0 %v5937_v39  ;;  %v6018_v39 = vld [vmem:[#allocation5 + $0x838] ss:$40 sps:$4 sm:$0xff]  }
 0x165   :  { %3628 = vmatpush1.bf16.msra.mxu1 %v5934_v38  ;;  %3486 = vmatprep.subr.bf16.mxu0 %v5945_v41  ;;  %v6023_v38 = vld [vmem:[#allocation5 + $0xa14] ss:$40 sps:$4 sm:$0xff]  }
 0x166   :  { %3629 = vmatprep.subr.bf16.mxu1 %v5942_v40  ;;  %v6021_v40 = vld [vmem:[#allocation5 + $0xa10] ss:$40 sps:$4 sm:$0xff]   ;;  %v6026_v41 = vld [vmem:[#allocation5 + $0x88c] ss:$40 sps:$4 sm:$0xff]  }
 0x168   :  { %3487 = vmatpush1.bf16.msra.mxu0 %v5943_v43  ;;  %v6024_v43 = vld [vmem:[#allocation5 + $0x888] ss:$40 sps:$4 sm:$0xff]  }
 0x169   :  { %3630 = vmatpush1.bf16.msra.mxu1 %v5940_v42  ;;  %3488 = vmatprep.subr.bf16.mxu0 %v5951_v45  ;;  %v6029_v42 = vld [vmem:[#allocation5 + $0xa64] ss:$40 sps:$4 sm:$0xff]  }
 0x16a   :  { %3631 = vmatprep.subr.bf16.mxu1 %v5948_v44  ;;  %v6027_v44 = vld [vmem:[#allocation5 + $0xa60] ss:$40 sps:$4 sm:$0xff]   ;;  %v6032_v45 = vld [vmem:[#allocation5 + $0x8dc] ss:$40 sps:$4 sm:$0xff]  }
 0x16c   :  { %3489 = vmatpush1.bf16.msra.mxu0 %v5949_v48  ;;  %v6030_v48 = vld [vmem:[#allocation5 + $0x8d8] ss:$40 sps:$4 sm:$0xff]  }
 0x16d   :  { %3632 = vmatpush1.bf16.msra.mxu1 %v5946_v46  ;;  %3490 = vmatprep.subr.bf16.mxu0 %v5957_v51  ;;  %v6035_v46 = vld [vmem:[#allocation5 + $0xab4] ss:$40 sps:$4 sm:$0xff]  }
 0x16e   :  { %3633 = vmatprep.subr.bf16.mxu1 %v5954_v50  ;;  %v6033_v50 = vld [vmem:[#allocation5 + $0xab0] ss:$40 sps:$4 sm:$0xff]   ;;  %v6038_v51 = vld [vmem:[#allocation5 + $0x92c] ss:$40 sps:$4 sm:$0xff]  }
 0x170   :  { %3491 = vmatpush1.bf16.msra.mxu0 %v5955_v54  ;;  %v6036_v54 = vld [vmem:[#allocation5 + $0x928] ss:$40 sps:$4 sm:$0xff]  }
 0x171   :  { %3634 = vmatpush1.bf16.msra.mxu1 %v5952_v53  ;;  %3492 = vmatprep.subr.bf16.mxu0 %v5963_v56  ;;  %v6041_v53 = vld [vmem:[#allocation5 + $0xb04] ss:$40 sps:$4 sm:$0xff]  }
 0x172   :  { %3644 = vmatprep.subr.bf16.mxu1 %v5960_v55  ;;  %v6039_v55 = vld [vmem:[#allocation5 + $0xb00] ss:$40 sps:$4 sm:$0xff]   ;;  %v6044_v56 = vld [vmem:[#allocation5 + $0x97c] ss:$40 sps:$4 sm:$0xff]  }
 0x174   :  { %3636 = vmatmul.mubr.bf16.vlgmr.msra.gmra.mrb[12].mxu1 %v6613_v8  ;;  %3493 = vmatpush1.bf16.msra.mxu0 %v5961_v58  ;;  %v6042_v58 = vld [vmem:[#allocation5 + $0x978] ss:$40 sps:$4 sm:$0xff]  }
 0x175   :  { %3645 = vmatpush1.bf16.msra.mxu1 %v5958_v57  ;;  %3494 = vmatprep.subr.bf16.mxu0 %v5969_v60  ;;  %v6047_v57 = vld [vmem:[#allocation5 + $0xb54] ss:$40 sps:$4 sm:$0xff]  }
 0x176   :  { %3646 = vmatprep.subr.bf16.mxu1 %v5966_v59  ;;  %3676 = vmatprep.mubr.bf16.mxu1 %v6621_v35  ;;  %v6045_v59 = vld [vmem:[#allocation5 + $0xb50] ss:$40 sps:$4 sm:$0xff]   ;;  %v6050_v60 = vld [vmem:[#allocation5 + $0x9cc] ss:$40 sps:$4 sm:$0xff]  }
 0x178   :  { %3495 = vmatpush1.bf16.msra.mxu0 %v5967_v62  ;;  %v6048_v62 = vld [vmem:[#allocation5 + $0x9c8] ss:$40 sps:$4 sm:$0xff]  }
 0x179   :  { %3647 = vmatpush1.bf16.msra.mxu1 %v5964_v61  ;;  %3496 = vmatprep.subr.bf16.mxu0 %v5975_v1  ;;  %v6053_v61 = vld [vmem:[#allocation5 + $0xba4] ss:$40 sps:$4 sm:$0xff]  }
 0x17a   :  { %3648 = vmatprep.subr.bf16.mxu1 %v5972_v63  ;;  %v6051_v63 = vld [vmem:[#allocation5 + $0xba0] ss:$40 sps:$4 sm:$0xff]   ;;  %v6056_v1 = vld [vmem:[#allocation5 + $0xa1c] ss:$40 sps:$4 sm:$0xff]  }
 0x17c   :  { %3497 = vmatpush1.bf16.msra.mxu0 %v5973_v3  ;;  %v6054_v3 = vld [vmem:[#allocation5 + $0xa18] ss:$40 sps:$4 sm:$0xff]  }
 0x17d   :  { %3649 = vmatpush1.bf16.msra.mxu1 %v5970_v2  ;;  %3498 = vmatprep.subr.bf16.mxu0 %v5981_v5  ;;  %v6059_v2 = vld [vmem:[#allocation5 + $0xbf4] ss:$40 sps:$4 sm:$0xff]  }
 0x17e   :  { %3650 = vmatprep.subr.bf16.mxu1 %v5978_v4  ;;  %v6057_v4 = vld [vmem:[#allocation5 + $0xbf0] ss:$40 sps:$4 sm:$0xff]   ;;  %v6062_v5 = vld [vmem:[#allocation5 + $0xa6c] ss:$40 sps:$4 sm:$0xff]  }
 0x180   :  { %3499 = vmatpush1.bf16.msra.mxu0 %v5979_v7  ;;  %v6060_v7 = vld [vmem:[#allocation5 + $0xa68] ss:$40 sps:$4 sm:$0xff]  }
 0x181   :  { %3651 = vmatpush1.bf16.msra.mxu1 %v5976_v6  ;;  %3500 = vmatprep.subr.bf16.mxu0 %v5987_v10  ;;  %v6065_v6 = vld [vmem:[#allocation5 + $0xc44] ss:$40 sps:$4 sm:$0xff]  }
 0x182   :  { %3652 = vmatprep.subr.bf16.mxu1 %v5984_v9  ;;  %v6063_v9 = vld [vmem:[#allocation5 + $0xc40] ss:$40 sps:$4 sm:$0xff]   ;;  %v6068_v10 = vld [vmem:[#allocation5 + $0xabc] ss:$40 sps:$4 sm:$0xff]  }
 0x184   :  { %3501 = vmatpush1.bf16.msra.mxu0 %v5985_v12  ;;  %v6066_v12 = vld [vmem:[#allocation5 + $0xab8] ss:$40 sps:$4 sm:$0xff]  }
 0x185   :  { %3653 = vmatpush1.bf16.msra.mxu1 %v5982_v11  ;;  %3502 = vmatprep.subr.bf16.mxu0 %v5993_v14  ;;  %v6071_v11 = vld [vmem:[#allocation5 + $0xc94] ss:$40 sps:$4 sm:$0xff]  }
 0x186   :  { %3654 = vmatprep.subr.bf16.mxu1 %v5990_v13  ;;  %v6069_v13 = vld [vmem:[#allocation5 + $0xc90] ss:$40 sps:$4 sm:$0xff]   ;;  %v6074_v14 = vld [vmem:[#allocation5 + $0xb0c] ss:$40 sps:$4 sm:$0xff]  }
 0x188   :  { %3503 = vmatpush1.bf16.msra.mxu0 %v5991_v17  ;;  %v6072_v17 = vld [vmem:[#allocation5 + $0xb08] ss:$40 sps:$4 sm:$0xff]  }
 0x189   :  { %3655 = vmatpush1.bf16.msra.mxu1 %v5988_v16  ;;  %3504 = vmatprep.subr.bf16.mxu0 %v5999_v21  ;;  %v6077_v16 = vld [vmem:[#allocation5 + $0xce4] ss:$40 sps:$4 sm:$0xff]  }
 0x18a   :  { %3656 = vmatprep.subr.bf16.mxu1 %v5996_v20  ;;  %v6075_v20 = vld [vmem:[#allocation5 + $0xce0] ss:$40 sps:$4 sm:$0xff]   ;;  %v6080_v21 = vld [vmem:[#allocation5 + $0xb5c] ss:$40 sps:$4 sm:$0xff]  }
 0x18c   :  { %3505 = vmatpush1.bf16.msra.mxu0 %v5997_v24  ;;  %v6078_v24 = vld [vmem:[#allocation5 + $0xb58] ss:$40 sps:$4 sm:$0xff]  }
 0x18d   :  { %3657 = vmatpush1.bf16.msra.mxu1 %v5994_v22  ;;  %3506 = vmatprep.subr.bf16.mxu0 %v6005_v26  ;;  %v6083_v22 = vld [vmem:[#allocation5 + $0xd34] ss:$40 sps:$4 sm:$0xff]  }
 0x18e   :  { %3658 = vmatprep.subr.bf16.mxu1 %v6002_v25  ;;  %v6081_v25 = vld [vmem:[#allocation5 + $0xd30] ss:$40 sps:$4 sm:$0xff]   ;;  %v6086_v26 = vld [vmem:[#allocation5 + $0xbac] ss:$40 sps:$4 sm:$0xff]  }
 0x190   :  { %3507 = vmatpush1.bf16.msra.mxu0 %v6003_v28  ;;  %v6084_v28 = vld [vmem:[#allocation5 + $0xba8] ss:$40 sps:$4 sm:$0xff]  }
 0x191   :  { %3659 = vmatpush1.bf16.msra.mxu1 %v6000_v27  ;;  %3508 = vmatprep.subr.bf16.mxu0 %v6011_v30  ;;  %v6089_v27 = vld [vmem:[#allocation5 + $0xd84] ss:$40 sps:$4 sm:$0xff]  }
 0x192   :  { %3660 = vmatprep.subr.bf16.mxu1 %v6008_v29  ;;  %v6087_v29 = vld [vmem:[#allocation5 + $0xd80] ss:$40 sps:$4 sm:$0xff]   ;;  %v6092_v30 = vld [vmem:[#allocation5 + $0xbfc] ss:$40 sps:$4 sm:$0xff]  }
 0x194   :  { %3509 = vmatpush1.bf16.msra.mxu0 %v6009_v18  ;;  %v6090_v18 = vld [vmem:[#allocation5 + $0xbf8] ss:$40 sps:$4 sm:$0xff]  }
 0x195   :  { %3661 = vmatpush1.bf16.msra.mxu1 %v6006_v31  ;;  %3510 = vmatprep.subr.bf16.mxu0 %v6017_v33  ;;  %v6095_v31 = vld [vmem:[#allocation5 + $0xdd4] ss:$40 sps:$4 sm:$0xff]  }
 0x196   :  { %3662 = vmatprep.subr.bf16.mxu1 %v6014_v32  ;;  %v6093_v32 = vld [vmem:[#allocation5 + $0xdd0] ss:$40 sps:$4 sm:$0xff]   ;;  %v6098_v33 = vld [vmem:[#allocation5 + $0xc4c] ss:$40 sps:$4 sm:$0xff]  }
 0x198   :  { %3511 = vmatpush1.bf16.msra.mxu0 %v6015_v36  ;;  %v6096_v36 = vld [vmem:[#allocation5 + $0xc48] ss:$40 sps:$4 sm:$0xff]  }
 0x199   :  { %3663 = vmatpush1.bf16.msra.mxu1 %v6012_v34  ;;  %3521 = vmatprep.subr.bf16.mxu0 %v6023_v38  ;;  %v6101_v34 = vld [vmem:[#allocation5 + $0xe24] ss:$40 sps:$4 sm:$0xff]  }
 0x19a   :  { %3664 = vmatprep.subr.bf16.mxu1 %v6020_v37  ;;  %v6099_v37 = vld [vmem:[#allocation5 + $0xe20] ss:$40 sps:$4 sm:$0xff]   ;;  %v6104_v38 = vld [vmem:[#allocation5 + $0xc9c] ss:$40 sps:$4 sm:$0xff]  }
 0x19b   :  { %3513 = vmatmul.mubr.bf16.vlgmr.msra.gmra.mrb[4].mxu0 %v6627_v15 }
 0x19c   :  { %3522 = vmatpush1.bf16.msra.mxu0 %v6021_v40  ;;  %3553 = vmatprep.mubr.bf16.mxu0 %v6633_v19  ;;  %v6102_v40 = vld [vmem:[#allocation5 + $0xc98] ss:$40 sps:$4 sm:$0xff]  }
 0x19d   :  { %3665 = vmatpush1.bf16.msra.mxu1 %v6018_v39  ;;  %3523 = vmatprep.subr.bf16.mxu0 %v6029_v42  ;;  %v6107_v39 = vld [vmem:[#allocation5 + $0xe74] ss:$40 sps:$4 sm:$0xff]  }
 0x19e   :  { %3666 = vmatprep.subr.bf16.mxu1 %v6026_v41  ;;  %v6105_v41 = vld [vmem:[#allocation5 + $0xe70] ss:$40 sps:$4 sm:$0xff]   ;;  %v6110_v42 = vld [vmem:[#allocation5 + $0xcec] ss:$40 sps:$4 sm:$0xff]  }
 0x1a0   :  { %3524 = vmatpush1.bf16.msra.mxu0 %v6027_v44  ;;  %v6108_v44 = vld [vmem:[#allocation5 + $0xce8] ss:$40 sps:$4 sm:$0xff]  }
 0x1a1   :  { %3667 = vmatpush1.bf16.msra.mxu1 %v6024_v43  ;;  %3525 = vmatprep.subr.bf16.mxu0 %v6035_v46  ;;  %v6113_v43 = vld [vmem:[#allocation5 + $0xec4] ss:$40 sps:$4 sm:$0xff]  }
 0x1a2   :  { %3668 = vmatprep.subr.bf16.mxu1 %v6032_v45  ;;  %v6111_v45 = vld [vmem:[#allocation5 + $0xec0] ss:$40 sps:$4 sm:$0xff]   ;;  %v6116_v46 = vld [vmem:[#allocation5 + $0xd3c] ss:$40 sps:$4 sm:$0xff]  }
 0x1a4   :  { %3526 = vmatpush1.bf16.msra.mxu0 %v6033_v50  ;;  %v6114_v50 = vld [vmem:[#allocation5 + $0xd38] ss:$40 sps:$4 sm:$0xff]  }
 0x1a5   :  { %3669 = vmatpush1.bf16.msra.mxu1 %v6030_v48  ;;  %3527 = vmatprep.subr.bf16.mxu0 %v6041_v53  ;;  %v6119_v48 = vld [vmem:[#allocation5 + $0x24] ss:$40 sps:$4 sm:$0xff]  }
 0x1a6   :  { %3670 = vmatprep.subr.bf16.mxu1 %v6038_v51  ;;  %v6117_v51 = vld [vmem:[#allocation5 + $0x20] ss:$40 sps:$4 sm:$0xff]   ;;  %v6122_v53 = vld [vmem:[#allocation5 + $0xd8c] ss:$40 sps:$4 sm:$0xff]  }
 0x1a8   :  { %3528 = vmatpush1.bf16.msra.mxu0 %v6039_v55  ;;  %v6120_v55 = vld [vmem:[#allocation5 + $0xd88] ss:$40 sps:$4 sm:$0xff]  }
 0x1a9   :  { %3671 = vmatpush1.bf16.msra.mxu1 %v6036_v54  ;;  %3529 = vmatprep.subr.bf16.mxu0 %v6047_v57  ;;  %v6125_v54 = vld [vmem:[#allocation5 + $0x74] ss:$40 sps:$4 sm:$0xff]  }
 0x1aa   :  { %3672 = vmatprep.subr.bf16.mxu1 %v6044_v56  ;;  %v6123_v56 = vld [vmem:[#allocation5 + $0x70] ss:$40 sps:$4 sm:$0xff]   ;;  %v6128_v57 = vld [vmem:[#allocation5 + $0xddc] ss:$40 sps:$4 sm:$0xff]  }
 0x1ac   :  { %3530 = vmatpush1.bf16.msra.mxu0 %v6045_v59  ;;  %v583_v59 = vlaneseq }
 0x1ad   :  { %3673 = vmatpush1.bf16.msra.mxu1 %v6042_v58  ;;  %3531 = vmatprep.subr.bf16.mxu0 %v6053_v61  ;;  %v6131_v58 = vld [vmem:[#allocation5 + $0xc4] ss:$40 sps:$4 sm:$0xff]   ;;  %v6129_v61 = vld [vmem:[#allocation5 + $0xc0] ss:$40 sps:$4 sm:$0xff]  }
 0x1ae   :  { %3674 = vmatprep.subr.bf16.mxu1 %v6050_v60  ;;  %v6126_v60 = vld [vmem:[#allocation5 + $0xdd8] ss:$40 sps:$4 sm:$0xff]  }
 0x1b0   :  { %3532 = vmatpush1.bf16.msra.mxu0 %v6051_v63  ;;  %v6137_v63 = vld [vmem:[#allocation5 + $0x114] ss:$40 sps:$4 sm:$0xff]  }
 0x1b1   :  { %3675 = vmatpush1.bf16.msra.mxu1 %v6048_v62  ;;  %3533 = vmatprep.subr.bf16.mxu0 %v6059_v2  ;;  %v6134_v62 = vld [vmem:[#allocation5 + $0xe2c] ss:$40 sps:$4 sm:$0xff]   ;;  %v6132_v2 = vld [vmem:[#allocation5 + $0xe28] ss:$40 sps:$4 sm:$0xff]  }
 0x1b2   :  { %3685 = vmatprep.subr.bf16.mxu1 %v6056_v1  ;;  %v6665_v1 = vshrl.u32 %v583_v59, 7 }
 0x1b4   :  { %3677 = vmatmul.mubr.bf16.vlgmr.msra.gmra.mrb[12].mxu1 %v6627_v15  ;;  %3534 = vmatpush1.bf16.msra.mxu0 %v6057_v4  ;;  %v6140_v4 = vld [vmem:[#allocation5 + $0xe7c] ss:$40 sps:$4 sm:$0xff]  }
 0x1b5   :  { %3686 = vmatpush1.bf16.msra.mxu1 %v6054_v3  ;;  %3535 = vmatprep.subr.bf16.mxu0 %v6065_v6  ;;  %v6135_v3 = vld [vmem:[#allocation5 + $0x110] ss:$40 sps:$4 sm:$0xff]  }
 0x1b6   :  { %3687 = vmatprep.subr.bf16.mxu1 %v6062_v5  ;;  %3717 = vmatprep.mubr.bf16.mxu1 %v6633_v19  ;;  %v6143_v5 = vld [vmem:[#allocation5 + $0x164] ss:$40 sps:$4 sm:$0xff]   ;;  %v6138_v6 = vld [vmem:[#allocation5 + $0xe78] ss:$40 sps:$4 sm:$0xff]  }
 0x1b8   :  { %3536 = vmatpush1.bf16.msra.mxu0 %v6063_v9  ;;  %v6668_v9 = vld [vmem:[#allocation7] sm:$0xff] }
 0x1b9   :  { %3688 = vmatpush1.bf16.msra.mxu1 %v6060_v7  ;;  %3537 = vmatprep.subr.bf16.mxu0 %v6071_v11  ;;  %v6141_v7 = vld [vmem:[#allocation5 + $0x160] ss:$40 sps:$4 sm:$0xff]   ;;  %v6146_v11 = vld [vmem:[#allocation5 + $0xecc] ss:$40 sps:$4 sm:$0xff]  }
 0x1ba   :  { %3689 = vmatprep.subr.bf16.mxu1 %v6068_v10  ;;  %v589_v10 = vsub.s32 1, %v6665_v1 }
 0x1bc   :  { %3538 = vmatpush1.bf16.msra.mxu0 %v6069_v13 }
 0x1bd   :  { %3690 = vmatpush1.bf16.msra.mxu1 %v6066_v12  ;;  %3539 = vmatprep.subr.bf16.mxu0 %v6077_v16  ;;  %v6149_v12 = vld [vmem:[#allocation5 + $0x1b4] ss:$40 sps:$4 sm:$0xff]   ;;  %v590_v16 = vrot.slane %v6668_v9, %v589_v10 }
 0x1be   :  { %3691 = vmatprep.subr.bf16.mxu1 %v6074_v14  ;;  %v6144_v14 = vld [vmem:[#allocation5 + $0xec8] ss:$40 sps:$4 sm:$0xff]  }
 0x1c0   :  { %3540 = vmatpush1.bf16.msra.mxu0 %v6075_v20  ;;  %v6152_v20 = vld [vmem:[#allocation5 + $0x204] ss:$40 sps:$4 sm:$0xff]  }
 0x1c1   :  { %3692 = vmatpush1.bf16.msra.mxu1 %v6072_v17  ;;  %3541 = vmatprep.subr.bf16.mxu0 %v6083_v22  ;;  %v6147_v17 = vld [vmem:[#allocation5 + $0x1b0] ss:$40 sps:$4 sm:$0xff]  }
 0x1c2   :  { %3693 = vmatprep.subr.bf16.mxu1 %v6080_v21  ;;  %v6158_v21 = vld [vmem:[#allocation5 + $0xf1c] ss:$40 sps:$4 sm:$0xff]  }
 0x1c4   :  { %3542 = vmatpush1.bf16.msra.mxu0 %v6081_v25 }
 0x1c5   :  { %3694 = vmatpush1.bf16.msra.mxu1 %v6078_v24  ;;  %3543 = vmatprep.subr.bf16.mxu0 %v6089_v27 }
 0x1c6   :  { %3695 = vmatprep.subr.bf16.mxu1 %v6086_v26 }
 0x1c8   :  { %3544 = vmatpush1.bf16.msra.mxu0 %v6087_v29  ;;  %v6156_v29 = vld [vmem:[#allocation5 + $0xf18] ss:$40 sps:$4 sm:$0xff]  }
 0x1c9   :  { %3696 = vmatpush1.bf16.msra.mxu1 %v6084_v28  ;;  %3545 = vmatprep.subr.bf16.mxu0 %v6095_v31  ;;  %v6150_v28 = vld [vmem:[#allocation5 + $0x200] ss:$40 sps:$4 sm:$0xff]  }
 0x1ca   :  { %3697 = vmatprep.subr.bf16.mxu1 %v6092_v30 }
 0x1cc   :  { %3546 = vmatpush1.bf16.msra.mxu0 %v6093_v32 }
 0x1cd   :  { %3698 = vmatpush1.bf16.msra.mxu1 %v6090_v18  ;;  %3547 = vmatprep.subr.bf16.mxu0 %v6101_v34  ;;  %v6155_v18 = vld [vmem:[#allocation5 + $0x254] ss:$40 sps:$4 sm:$0xff]   ;;  %v6153_v34 = vld [vmem:[#allocation5 + $0x250] ss:$40 sps:$4 sm:$0xff]  }
 0x1ce   :  { %3699 = vmatprep.subr.bf16.mxu1 %v6098_v33  ;;  %v6162_v33 = vld [vmem:[%s6974_s3 + $0x40] sm:$0xff]  }
 0x1d0   :  { %3548 = vmatpush1.bf16.msra.mxu0 %v6099_v37  ;;  %v6166_v37 = vld [vmem:[#allocation5 + $0x2f4] ss:$40 sps:$4 sm:$0xff]  }
 0x1d1   :  { %3700 = vmatpush1.bf16.msra.mxu1 %v6096_v36  ;;  %3549 = vmatprep.subr.bf16.mxu0 %v6107_v39  ;;  %v6161_v36 = vld [vmem:[#allocation5 + $0x2a4] ss:$40 sps:$4 sm:$0xff]   ;;  %v6164_v39 = vld [vmem:[#allocation5 + $0x2f0] ss:$40 sps:$4 sm:$0xff]  }
 0x1d2   :  { %3701 = vmatprep.subr.bf16.mxu1 %v6104_v38 }
 0x1d4   :  { %3550 = vmatpush1.bf16.msra.mxu0 %v6105_v41 }
 0x1d5   :  { %3702 = vmatpush1.bf16.msra.mxu1 %v6102_v40  ;;  %3551 = vmatprep.subr.bf16.mxu0 %v6113_v43  ;;  %v6167_v40 = vld [vmem:[%s6974_s3 + $0x48] sm:$0xff]  }
 0x1d6   :  { %3703 = vmatprep.subr.bf16.mxu1 %v6110_v42  ;;  %v6171_v43 = vld [vmem:[#allocation5 + $0x344] ss:$40 sps:$4 sm:$0xff]  }
 0x1d8   :  { %3552 = vmatpush1.bf16.msra.mxu0 %v6111_v45 }
 0x1d9   :  { %3704 = vmatpush1.bf16.msra.mxu1 %v6108_v44  ;;  %3767 = vmatprep.subr.bf16.mxu0 %v6119_v48  ;;  %v6694_v44 = vld [vmem:[#allocation2 + $0x18] ss:$0 sps:$4 sm:$0xff]   ;;  %v6168_v48 = vld [vmem:[%s6974_s3 + $0x8] sm:$0xff]  }
 0x1da   :  { %3705 = vmatprep.subr.bf16.mxu1 %v6116_v46 }
 0x1db   :  { %3554 = vmatmul.mubr.bf16.vlgmr.msra.gmra.mrb[4].mxu0 %v6641_v23 }
 0x1dc   :  { %3768 = vmatpush1.bf16.msra.mxu0 %v6117_v51  ;;  %3799 = vmatprep.mubr.bf16.mxu0 %v6609_v52  ;;  %v585_v52 = vsub.s32 0, %v6665_v1  ;;  %v6169_v51 = vld [vmem:[#allocation5 + $0x340] ss:$40 sps:$4 sm:$0xff]  }
 0x1dd   :  { %3706 = vmatpush1.bf16.msra.mxu1 %v6114_v50  ;;  %3769 = vmatprep.subr.bf16.mxu0 %v6125_v54  ;;  %v6176_v54 = vld [vmem:[#allocation5 + $0x394] ss:$40 sps:$4 sm:$0xff]  }
 0x1de   :  { %3707 = vmatprep.subr.bf16.mxu1 %v6122_v53  ;;  %v586_v13 = vrot.slane %v6668_v9, %v585_v52  ;;  %v6172_v53 = vld [vmem:[%s6974_s3 + $0x50] sm:$0xff]  }
 0x1e0   :  { %3770 = vmatpush1.bf16.msra.mxu0 %v6123_v56  ;;  %v6174_v56 = vld [vmem:[#allocation5 + $0x390] ss:$40 sps:$4 sm:$0xff]  }
 0x1e1   :  { %3708 = vmatpush1.bf16.msra.mxu1 %v6120_v55  ;;  %3771 = vmatprep.subr.bf16.mxu0 %v6131_v58  ;;  %v6173_v55 = vld [vmem:[%s6974_s3 + $0x10] sm:$0xff]   ;;  %v6181_v58 = vld [vmem:[#allocation5 + $0x3e4] ss:$40 sps:$4 sm:$0xff]  }
 0x1e2   :  { %3709 = vmatprep.subr.bf16.mxu1 %v6128_v57  ;;  %v6177_v57 = vld [vmem:[%s6974_s3 + $0x58] sm:$0xff]  }
 0x1e4   :  { %3772 = vmatpush1.bf16.msra.mxu0 %v6129_v61  ;;  %v6178_v61 = vld [vmem:[%s6974_s3 + $0x18] sm:$0xff]  }
 0x1e5   :  { %3710 = vmatpush1.bf16.msra.mxu1 %v6126_v60  ;;  %3773 = vmatprep.subr.bf16.mxu0 %v6137_v63  ;;  %v6179_v63 = vld [vmem:[#allocation5 + $0x3e0] ss:$40 sps:$4 sm:$0xff]  }
 0x1e6   :  { %3711 = vmatprep.subr.bf16.mxu1 %v6134_v62 }
 0x1e8   :  { %3774 = vmatpush1.bf16.msra.mxu0 %v6135_v3 }
 0x1e9   :  { %3712 = vmatpush1.bf16.msra.mxu1 %v6132_v2  ;;  %3775 = vmatprep.subr.bf16.mxu0 %v6143_v5  ;;  %v6182_v2 = vld [vmem:[%s6974_s3 + $0x60] sm:$0xff]  }
 0x1ea   :  { %3713 = vmatprep.subr.bf16.mxu1 %v6140_v4  ;;  %v6186_v4 = vld [vmem:[#allocation5 + $0x434] ss:$40 sps:$4 sm:$0xff]   ;;  %v6183_v5 = vld [vmem:[%s6974_s3 + $0x20] sm:$0xff]  }
 0x1ec   :  { %3776 = vmatpush1.bf16.msra.mxu0 %v6141_v7  ;;  %v6187_v7 = vld [vmem:[%s6974_s3 + $0x68] sm:$0xff]  }
 0x1ed   :  { %3714 = vmatpush1.bf16.msra.mxu1 %v6138_v6  ;;  %3777 = vmatprep.subr.bf16.mxu0 %v6149_v12  ;;  %v6184_v6 = vld [vmem:[#allocation5 + $0x430] ss:$40 sps:$4 sm:$0xff]   ;;  %v6191_v12 = vld [vmem:[#allocation5 + $0x484] ss:$40 sps:$4 sm:$0xff]  }
 0x1ee   :  { %3715 = vmatprep.subr.bf16.mxu1 %v6146_v11  ;;  %v3227_v22 = vpop.f32.mrb[0].mxu0  ;;  %v597_v11 = vsub.s32 3, %v6665_v1 }
 0x1ef   :  { %v5463_v24 = vadd.f32 %v3227_v22, %v586_v13  ;;  %v3229_v25 = vpop.f32.mrb[1].mxu0  ;;  %v6188_v13 = vld [vmem:[%s6974_s3 + $0x28] sm:$0xff]  }
 0x1f0   :  { %v5465_v26 = vadd.f32 %v3229_v25, %v590_v16  ;;  %v3231_v27 = vpop.f32.mrb[2].mxu0  ;;  %3778 = vmatpush1.bf16.msra.mxu0 %v6147_v17  ;;  %v6192_v16 = vld [vmem:[%s6974_s3 + $0x70] sm:$0xff]   ;;  %v598_v17 = vrot.slane %v6668_v9, %v597_v11 }
 0x1f1   :  { %3716 = vmatpush1.bf16.msra.mxu1 %v6144_v14  ;;  %v6678_v30 = vadd.f32 %v5463_v24, %v6649_v47  ;;  %v3232_v31 = vpop.f32.mrb[3].mxu0  ;;  %3779 = vmatprep.subr.bf16.mxu0 %v6152_v20  ;;  %v6159_v47 = vld [vmem:[#allocation5 + $0x2a0] ss:$40 sps:$4 sm:$0xff]   ;;  %v6196_v20 = vld [vmem:[#allocation5 + $0x4d4] ss:$40 sps:$4 sm:$0xff]  }
 0x1f2   :  { %3726 = vmatprep.subr.bf16.mxu1 %v6158_v21  ;;  %v5466_v32 = vadd.f32 %v5465_v26, %v6652_v49  ;;  %v6163_v49 = vld [vmem:[%s6974_s3] sm:$0xff]   ;;  %v6193_v21 = vld [vmem:[%s6974_s3 + $0x30] sm:$0xff]   ;;  %v6197_v24 = vld [vmem:[%s6974_s3 + $0x78] sm:$0xff]  }
 0x1f3   :  { %v6189_v14 = vld [vmem:[#allocation5 + $0x480] ss:$40 sps:$4 sm:$0xff]   ;;  %v6194_v22 = vld [vmem:[#allocation5 + $0x4d0] ss:$40 sps:$4 sm:$0xff]   ;;  %v6201_v26 = vld [vmem:[#allocation5 + $0x524] ss:$40 sps:$4 sm:$0xff]  }
 0x1f4   :  { %3718 = vmatmul.mubr.bf16.vlgmr.msra.gmra.mrb[12].mxu1 %v6641_v23  ;;  %3780 = vmatpush1.bf16.msra.mxu0 %v6150_v28  ;;  %v3932_v38 = vmax.f32 %v5466_v32, 0.0  ;;  %v6198_v27 = vld [vmem:[%s6974_s3 + $0x38] sm:$0xff]   ;;  %v3931_v28 = vmax.f32 %v6678_v30, 0.0  ;;  %v6202_v31 = vld [vmem:[%s6974_s3 + $0xc0] sm:$0xff]   ;;  %v6204_v30 = vld [vmem:[#allocation5 + $0x570] ss:$40 sps:$4 sm:$0xff]  }
 0x1f5   :  { %3727 = vmatpush1.bf16.msra.mxu1 %v6156_v29  ;;  %3781 = vmatprep.subr.bf16.mxu0 %v6155_v18  ;;  %v6199_v29 = vld [vmem:[#allocation5 + $0x520] ss:$40 sps:$4 sm:$0xff]   ;;  %v6206_v32 = vld [vmem:[#allocation5 + $0x574] ss:$40 sps:$4 sm:$0xff]  }
 0x1f6   :  { %3758 = vmatprep.mubr.bf16.mxu1 %v6508_v0  ;;  %5375 = vmatprep.subr.bf16.mxu1 %v6162_v33  ;;  %v3942_v41 = vpack.c.bf16 %v3932_v38, %v3932_v38  ;;  %v6203_v33 = vld [vmem:[%s6974_s3 + $0x80] sm:$0xff]  }
 0x1f7   :  { %v6209_v38 = vld [vmem:[#allocation5 + $0x5c0] ss:$40 sps:$4 sm:$0xff]  }
 0x1f8   :  { %3782 = vmatpush1.bf16.msra.mxu0 %v6153_v34  ;;  %v3941_v34 = vpack.c.bf16 %v3931_v28, %v3931_v28  ;;  %v6248_v28 = vld [vmem:[#allocation5 + $0x890] ss:$40 sps:$4 sm:$0xff]  }
 0x1f9   :  { %3783 = vmatprep.subr.bf16.mxu0 %v6161_v36  ;;  %v6207_v36 = vld [vmem:[%s6974_s3 + $0xc8] sm:$0xff]  }
 0x1fc   :  { %3784 = vmatpush1.bf16.msra.mxu0 %v6159_v47 }
 0x1fd   :  { %3785 = vmatprep.subr.bf16.mxu0 %v6166_v37  ;;  %v6211_v37 = vld [vmem:[#allocation5 + $0x5c4] ss:$40 sps:$4 sm:$0xff]  }
 0x1ff   :  { %v6692_v42 = vpop.f32.mrb[4].mxu1 }
 0x200   :  { %5296 = vmatmul.mubr.msk.bf16.vlgmr.msra.gmra.mrb[12].mxu1 %vm3107_vm0, %v6694_v44  ;;  %v3434_v45 = vpop.f32.mrb[5].mxu1  ;;  %3786 = vmatpush1.bf16.msra.mxu0 %v6164_v39  ;;  %v6216_v39 = vld [vmem:[#allocation5 + $0x614] ss:$40 sps:$4 sm:$0xff]  }
 0x201   :  { %5376 = vmatpush3.bf16.msra.mxu1 %v6163_v49  ;;  %4594 = vmatprep.mubr.bf16.mxu1 %v3942_v41  ;;  %v3436_v46 = vpop.f32.mrb[6].mxu1  ;;  %v5468_v25 = vadd.f32 %v3434_v45, %v598_v17  ;;  %v6212_v49 = vld [vmem:[%s6974_s3 + $0xd0] sm:$0xff]   ;;  %v6217_v41 = vld [vmem:[%s6974_s3 + $0xd8] sm:$0xff]  }
 0x202   :  { %v3437_v50 = vpop.f32.mrb[7].mxu1  ;;  %5377 = vmatprep.subr.bf16.mxu1 %v6167_v40  ;;  %3787 = vmatprep.subr.bf16.mxu0 %v6171_v43  ;;  %v6214_v40 = vld [vmem:[#allocation5 + $0x610] ss:$40 sps:$4 sm:$0xff]   ;;  %v6221_v43 = vld [vmem:[#allocation5 + $0x664] ss:$40 sps:$4 sm:$0xff]   ;;  %v6218_v45 = vld [vmem:[%s6974_s3 + $0x98] sm:$0xff]  }
 0x203   :  { %v3934_v18 = vmax.f32 %v5468_v25, 0.0  ;;  %v6219_v46 = vld [vmem:[#allocation5 + $0x660] ss:$40 sps:$4 sm:$0xff]   ;;  %v6226_v50 = vld [vmem:[#allocation5 + $0x6b4] ss:$40 sps:$4 sm:$0xff]  }
 0x204   :  { %3788 = vmatpush1.bf16.msra.mxu0 %v6169_v51  ;;  %v6223_v51 = vld [vmem:[%s6974_s3 + $0xa0] sm:$0xff]   ;;  %v6242_v17 = vld [vmem:[#allocation5 + $0x7f0] ss:$40 sps:$4 sm:$0xff]  }
 0x205   :  { %5378 = vmatpush3.bf16.msra.mxu1 %v6168_v48  ;;  %3789 = vmatprep.subr.bf16.mxu0 %v6176_v54  ;;  %v3944_v47 = vpack.c.bf16 %v3934_v18, %v3934_v18  ;;  %v6222_v48 = vld [vmem:[%s6974_s3 + $0xe0] sm:$0xff]   ;;  %v6224_v54 = vld [vmem:[#allocation5 + $0x6b0] ss:$40 sps:$4 sm:$0xff]   ;;  %v6321_v18 = vld [vmem:[%s6974_s3 + $0x118] sm:$0xff]  }
 0x206   :  { %5379 = vmatprep.subr.bf16.mxu1 %v6172_v53  ;;  %v593_v53 = vsub.s32 2, %v6665_v1  ;;  %v6318_v25 = vld [vmem:[%s6974_s3 + $0x150] sm:$0xff]  }
 0x207   :  { %v6710_v59 = vpop.f32.mrb[8].mxu1 }
 0x208   :  { %v6712_v60 = vpop.f32.mrb[9].mxu1  ;;  %3790 = vmatpush1.bf16.msra.mxu0 %v6174_v56  ;;  %v6231_v56 = vld [vmem:[#allocation5 + $0x704] ss:$40 sps:$4 sm:$0xff]  }
 0x209   :  { %5380 = vmatpush3.bf16.msra.mxu1 %v6173_v55  ;;  %v3600_v62 = vpop.f32.mrb[10].mxu1  ;;  %3791 = vmatprep.subr.bf16.mxu0 %v6181_v58  ;;  %v6227_v55 = vld [vmem:[%s6974_s3 + $0xe8] sm:$0xff]   ;;  %v594_v58 = vrot.slane %v6668_v9, %v593_v53 }
 0x20a   :  { %5381 = vmatprep.subr.bf16.mxu1 %v6177_v57  ;;  %v3601_v3 = vpop.f32.mrb[11].mxu1  ;;  %v6228_v57 = vld [vmem:[%s6974_s3 + $0xa8] sm:$0xff]   ;;  %v6232_v62 = vld [vmem:[%s6974_s3 + $0xf0] sm:$0xff]  }
 0x20b   :  { %v5467_v3 = vadd.f32 %v6692_v42, %v594_v58  ;;  %v6311_v42 = vld [vmem:[%s6974_s3 + $0x140] sm:$0xff]  }
 0x20c   :  { %3792 = vmatpush1.bf16.msra.mxu0 %v6179_v63  ;;  %v6236_v63 = vld [vmem:[#allocation5 + $0x754] ss:$40 sps:$4 sm:$0xff]   ;;  %v6271_v53 = vld [vmem:[#allocation5 + $0xac4] ss:$40 sps:$4 sm:$0xff]   ;;  %v6275_v58 = vld [vmem:[#allocation5 + $0xb60] ss:$40 sps:$4 sm:$0xff]  }
 0x20d   :  { %5382 = vmatpush3.bf16.msra.mxu1 %v6178_v61  ;;  %3793 = vmatprep.subr.bf16.mxu0 %v6186_v4  ;;  %v6229_v61 = vld [vmem:[#allocation5 + $0x700] ss:$40 sps:$4 sm:$0xff]   ;;  %v6234_v4 = vld [vmem:[#allocation5 + $0x750] ss:$40 sps:$4 sm:$0xff]   ;;  %v3933_v11 = vmax.f32 %v5467_v3, 0.0 }
 0x20e   :  { %5383 = vmatprep.subr.bf16.mxu1 %v6182_v2  ;;  %v6233_v2 = vld [vmem:[%s6974_s3 + $0xb0] sm:$0xff]   ;;  %v6289_v3 = vld [vmem:[#allocation5 + $0xca4] ss:$40 sps:$4 sm:$0xff]  }
 0x210   :  { %3794 = vmatpush1.bf16.msra.mxu0 %v6184_v6  ;;  %v6241_v6 = vld [vmem:[#allocation5 + $0x7a4] ss:$40 sps:$4 sm:$0xff]  }
 0x211   :  { %5384 = vmatpush3.bf16.msra.mxu1 %v6183_v5  ;;  %3795 = vmatprep.subr.bf16.mxu0 %v6191_v12  ;;  %v6237_v5 = vld [vmem:[%s6974_s3 + $0xf8] sm:$0xff]  }
 0x212   :  { %5385 = vmatprep.subr.bf16.mxu1 %v6187_v7  ;;  %v6238_v7 = vld [vmem:[%s6974_s3 + $0xb8] sm:$0xff]  }
 0x213   :  { %v6239_v12 = vld [vmem:[#allocation5 + $0x7a0] ss:$40 sps:$4 sm:$0xff]  }
 0x214   :  { %3796 = vmatpush1.bf16.msra.mxu0 %v6189_v14  ;;  %v6312_v14 = vld [vmem:[%s6974_s3 + $0x100] sm:$0xff]  }
 0x215   :  { %5386 = vmatpush3.bf16.msra.mxu1 %v6188_v13  ;;  %3797 = vmatprep.subr.bf16.mxu0 %v6196_v20  ;;  %v6244_v13 = vld [vmem:[#allocation5 + $0x7f4] ss:$40 sps:$4 sm:$0xff]   ;;  %v6316_v20 = vld [vmem:[%s6974_s3 + $0x148] sm:$0xff]  }
 0x216   :  { %5387 = vmatprep.subr.bf16.mxu1 %v6192_v16  ;;  %v3943_v16 = vpack.c.bf16 %v3933_v11, %v3933_v11  ;;  %v6293_v11 = vld [vmem:[#allocation5 + $0xd40] ss:$40 sps:$4 sm:$0xff]  }
 0x218   :  { %3798 = vmatpush1.bf16.msra.mxu0 %v6194_v22  ;;  %v6317_v22 = vld [vmem:[%s6974_s3 + $0x108] sm:$0xff]  }
 0x219   :  { %5388 = vmatpush3.bf16.msra.mxu1 %v6193_v21  ;;  %3808 = vmatprep.subr.bf16.mxu0 %v6201_v26  ;;  %v6247_v21 = vld [vmem:[#allocation5 + $0x844] ss:$40 sps:$4 sm:$0xff]   ;;  %v6250_v26 = vld [vmem:[#allocation5 + $0x894] ss:$40 sps:$4 sm:$0xff]  }
 0x21a   :  { %5389 = vmatprep.subr.bf16.mxu1 %v6197_v24  ;;  %v6245_v24 = vld [vmem:[#allocation5 + $0x840] ss:$40 sps:$4 sm:$0xff]  }
 0x21b   :  { %3800 = vmatmul.mubr.bf16.vlgmr.msra.gmra.mrb[8].mxu0 %v6613_v8  ;;  %v6208_v8 = vld [vmem:[%s6974_s3 + $0x88] sm:$0xff]  }
 0x21c   :  { %3809 = vmatpush1.bf16.msra.mxu0 %v6199_v29  ;;  %3840 = vmatprep.mubr.bf16.mxu0 %v6621_v35  ;;  %v6213_v35 = vld [vmem:[%s6974_s3 + $0x90] sm:$0xff]   ;;  %v6320_v29 = vld [vmem:[%s6974_s3 + $0x158] sm:$0xff]  }
 0x21d   :  { %5390 = vmatpush3.bf16.msra.mxu1 %v6198_v27  ;;  %3810 = vmatprep.subr.bf16.mxu0 %v6206_v32  ;;  %v6319_v27 = vld [vmem:[%s6974_s3 + $0x110] sm:$0xff]   ;;  %v6251_v32 = vld [vmem:[#allocation5 + $0x8e0] ss:$40 sps:$4 sm:$0xff]  }
 0x21e   :  { %5397 = vmatprep.subr.bf16.mxu1 %v6202_v31  ;;  %v6253_v31 = vld [vmem:[#allocation5 + $0x8e4] ss:$40 sps:$4 sm:$0xff]  }
 0x220   :  { %4595 = vmatmul.mubr.bf16.vlgmr.msra.gmra.mrb[16].mxu1 %v3941_v34  ;;  %3811 = vmatpush1.bf16.msra.mxu0 %v6204_v30  ;;  %v6256_v34 = vld [vmem:[#allocation5 + $0x934] ss:$40 sps:$4 sm:$0xff]   ;;  %v6323_v30 = vld [vmem:[%s6974_s3 + $0x120] sm:$0xff]  }
 0x221   :  { %5398 = vmatpush3.bf16.msra.mxu1 %v6203_v33  ;;  %4634 = vmatprep.mubr.bf16.mxu1 %v3944_v47  ;;  %v6322_v33 = vld [vmem:[%s6974_s3 + $0x160] sm:$0xff]   ;;  %v6324_v47 = vld [vmem:[%s6974_s3 + $0x168] sm:$0xff]  }
 0x222   :  { %5399 = vmatprep.subr.bf16.mxu1 %v6207_v36  ;;  %3812 = vmatprep.subr.bf16.mxu0 %v6211_v37  ;;  %v6254_v36 = vld [vmem:[#allocation5 + $0x930] ss:$40 sps:$4 sm:$0xff]   ;;  %v6259_v37 = vld [vmem:[#allocation5 + $0x984] ss:$40 sps:$4 sm:$0xff]  }
 0x224   :  { %3813 = vmatpush1.bf16.msra.mxu0 %v6209_v38  ;;  %v6257_v38 = vld [vmem:[#allocation5 + $0x980] ss:$40 sps:$4 sm:$0xff]  }
 0x225   :  { %5400 = vmatpush3.bf16.msra.mxu1 %v6208_v8  ;;  %3814 = vmatprep.subr.bf16.mxu0 %v6216_v39  ;;  %v6325_v8 = vld [vmem:[%s6974_s3 + $0x128] sm:$0xff]   ;;  %v6262_v39 = vld [vmem:[#allocation5 + $0x9d4] ss:$40 sps:$4 sm:$0xff]  }
 0x226   :  { %5401 = vmatprep.subr.bf16.mxu1 %v6212_v49  ;;  %v6326_v49 = vld [vmem:[%s6974_s3 + $0x170] sm:$0xff]  }
 0x228   :  { %3815 = vmatpush1.bf16.msra.mxu0 %v6214_v40  ;;  %v6260_v40 = vld [vmem:[#allocation5 + $0x9d0] ss:$40 sps:$4 sm:$0xff]  }
 0x229   :  { %5402 = vmatpush3.bf16.msra.mxu1 %v6213_v35  ;;  %3816 = vmatprep.subr.bf16.mxu0 %v6221_v43  ;;  %v6327_v35 = vld [vmem:[%s6974_s3 + $0x130] sm:$0xff]   ;;  %v6265_v43 = vld [vmem:[#allocation5 + $0xa24] ss:$40 sps:$4 sm:$0xff]  }
 0x22a   :  { %5403 = vmatprep.subr.bf16.mxu1 %v6217_v41  ;;  %v6328_v41 = vld [vmem:[%s6974_s3 + $0x178] sm:$0xff]  }
 0x22c   :  { %3817 = vmatpush1.bf16.msra.mxu0 %v6219_v46  ;;  %v6263_v46 = vld [vmem:[#allocation5 + $0xa20] ss:$40 sps:$4 sm:$0xff]  }
 0x22d   :  { %5404 = vmatpush3.bf16.msra.mxu1 %v6218_v45  ;;  %3818 = vmatprep.subr.bf16.mxu0 %v6226_v50  ;;  %v6329_v45 = vld [vmem:[%s6974_s3 + $0x138] sm:$0xff]   ;;  %v6330_v50 = vld [vmem:[%s6974_s3 + $0x1c0] sm:$0xff]  }
 0x22e   :  { %5405 = vmatprep.subr.bf16.mxu1 %v6222_v48  ;;  %v6268_v48 = vld [vmem:[#allocation5 + $0xa74] ss:$40 sps:$4 sm:$0xff]  }
 0x230   :  { %3819 = vmatpush1.bf16.msra.mxu0 %v6224_v54  ;;  %v6269_v54 = vld [vmem:[#allocation5 + $0xac0] ss:$40 sps:$4 sm:$0xff]  }
 0x231   :  { %5406 = vmatpush3.bf16.msra.mxu1 %v6223_v51  ;;  %3820 = vmatprep.subr.bf16.mxu0 %v6231_v56  ;;  %v6266_v51 = vld [vmem:[#allocation5 + $0xa70] ss:$40 sps:$4 sm:$0xff]  }
 0x232   :  { %5407 = vmatprep.subr.bf16.mxu1 %v6227_v55  ;;  %v6274_v55 = vld [vmem:[#allocation5 + $0xb14] ss:$40 sps:$4 sm:$0xff]   ;;  %v6272_v56 = vld [vmem:[#allocation5 + $0xb10] ss:$40 sps:$4 sm:$0xff]  }
 0x234   :  { %3821 = vmatpush1.bf16.msra.mxu0 %v6229_v61  ;;  %v6278_v61 = vld [vmem:[#allocation5 + $0xbb0] ss:$40 sps:$4 sm:$0xff]  }
 0x235   :  { %5408 = vmatpush3.bf16.msra.mxu1 %v6228_v57  ;;  %3822 = vmatprep.subr.bf16.mxu0 %v6236_v63  ;;  %v6277_v57 = vld [vmem:[#allocation5 + $0xb64] ss:$40 sps:$4 sm:$0xff]   ;;  %v6286_v63 = vld [vmem:[#allocation5 + $0xc54] ss:$40 sps:$4 sm:$0xff]  }
 0x236   :  { %5409 = vmatprep.subr.bf16.mxu1 %v6232_v62  ;;  %v6283_v62 = vld [vmem:[#allocation5 + $0xc04] ss:$40 sps:$4 sm:$0xff]  }
 0x238   :  { %3823 = vmatpush1.bf16.msra.mxu0 %v6234_v4  ;;  %v6287_v4 = vld [vmem:[#allocation5 + $0xca0] ss:$40 sps:$4 sm:$0xff]  }
 0x239   :  { %5410 = vmatpush3.bf16.msra.mxu1 %v6233_v2  ;;  %3824 = vmatprep.subr.bf16.mxu0 %v6241_v6  ;;  %v6284_v2 = vld [vmem:[#allocation5 + $0xc50] ss:$40 sps:$4 sm:$0xff]  }
 0x23a   :  { %5411 = vmatprep.subr.bf16.mxu1 %v6237_v5  ;;  %v6292_v5 = vld [vmem:[#allocation5 + $0xcf4] ss:$40 sps:$4 sm:$0xff]   ;;  %v6290_v6 = vld [vmem:[#allocation5 + $0xcf0] ss:$40 sps:$4 sm:$0xff]  }
 0x23c   :  { %3825 = vmatpush1.bf16.msra.mxu0 %v6239_v12  ;;  %v6298_v12 = vld [vmem:[#allocation5 + $0xd94] ss:$40 sps:$4 sm:$0xff]  }
 0x23d   :  { %5412 = vmatpush3.bf16.msra.mxu1 %v6238_v7  ;;  %3826 = vmatprep.subr.bf16.mxu0 %v6244_v13  ;;  %v6295_v7 = vld [vmem:[#allocation5 + $0xd44] ss:$40 sps:$4 sm:$0xff]  }
 0x23e   :  { %5419 = vmatprep.subr.bf16.mxu1 %v6311_v42  ;;  %v6296_v42 = vld [vmem:[#allocation5 + $0xd90] ss:$40 sps:$4 sm:$0xff]   ;;  %v6301_v13 = vld [vmem:[#allocation5 + $0xde4] ss:$40 sps:$4 sm:$0xff]  }
 0x240   :  { %4635 = vmatmul.mubr.bf16.vlgmr.msra.gmra.mrb[20].mxu1 %v3943_v16  ;;  %3827 = vmatpush1.bf16.msra.mxu0 %v6242_v17  ;;  %v6304_v16 = vld [vmem:[#allocation5 + $0xe34] ss:$40 sps:$4 sm:$0xff]   ;;  %v6302_v17 = vld [vmem:[#allocation5 + $0xe30] ss:$40 sps:$4 sm:$0xff]  }
 0x241   :  { %5420 = vmatpush3.bf16.msra.mxu1 %v6312_v14  ;;  %3828 = vmatprep.subr.bf16.mxu0 %v6247_v21  ;;  %v6299_v14 = vld [vmem:[#allocation5 + $0xde0] ss:$40 sps:$4 sm:$0xff]  }
 0x242   :  { %5421 = vmatprep.subr.bf16.mxu1 %v6316_v20  ;;  %v6307_v20 = vld [vmem:[#allocation5 + $0xe84] ss:$40 sps:$4 sm:$0xff]   ;;  %v6305_v21 = vld [vmem:[#allocation5 + $0xe80] ss:$40 sps:$4 sm:$0xff]  }
 0x244   :  { %3829 = vmatpush1.bf16.msra.mxu0 %v6245_v24  ;;  %v6308_v24 = vld [vmem:[#allocation5 + $0xed0] ss:$40 sps:$4 sm:$0xff]  }
 0x245   :  { %5422 = vmatpush3.bf16.msra.mxu1 %v6317_v22  ;;  %3830 = vmatprep.subr.bf16.mxu0 %v6250_v26  ;;  %v6310_v22 = vld [vmem:[#allocation5 + $0xed4] ss:$40 sps:$4 sm:$0xff]   ;;  %v6313_v26 = vld [vmem:[#allocation5 + $0xf20] ss:$40 sps:$4 sm:$0xff]  }
 0x246   :  { %5423 = vmatprep.subr.bf16.mxu1 %v6318_v25  ;;  %v6315_v25 = vld [vmem:[#allocation5 + $0xf24] ss:$40 sps:$4 sm:$0xff]  }
 0x248   :  { %3831 = vmatpush1.bf16.msra.mxu0 %v6248_v28  ;;  %v605_v28 = vsub.s32 5, %v6665_v1 }
 0x249   :  { %5424 = vmatpush3.bf16.msra.mxu1 %v6319_v27  ;;  %3832 = vmatprep.subr.bf16.mxu0 %v6253_v31  ;;  %v601_v27 = vsub.s32 4, %v6665_v1 }
 0x24a   :  { %5425 = vmatprep.subr.bf16.mxu1 %v6320_v29  ;;  %v606_v31 = vrot.slane %v6668_v9, %v605_v28  ;;  %v5298_v28 = vld [vmem:[#allocation8] ss:$0 sm:$0xff] }
 0x24b   :  { %v602_v29 = vrot.slane %v6668_v9, %v601_v27  ;;  %v6356_v27 = vld [vmem:[%s6974_s3 + $0x250] sm:$0xff]  }
 0x24c   :  { %3833 = vmatpush1.bf16.msra.mxu0 %v6251_v32 }
 0x24d   :  { %5426 = vmatpush3.bf16.msra.mxu1 %v6321_v18  ;;  %3834 = vmatprep.subr.bf16.mxu0 %v6256_v34 }
 0x24e   :  { %5427 = vmatprep.subr.bf16.mxu1 %v6322_v33 }
 0x250   :  { %3835 = vmatpush1.bf16.msra.mxu0 %v6254_v36 }
 0x251   :  { %5428 = vmatpush3.bf16.msra.mxu1 %v6323_v30  ;;  %3836 = vmatprep.subr.bf16.mxu0 %v6259_v37 }
 0x252   :  { %5429 = vmatprep.subr.bf16.mxu1 %v6324_v47 }
 0x254   :  { %3837 = vmatpush1.bf16.msra.mxu0 %v6257_v38 }
 0x255   :  { %5430 = vmatpush3.bf16.msra.mxu1 %v6325_v8  ;;  %3838 = vmatprep.subr.bf16.mxu0 %v6262_v39  ;;  %v6332_v39 = vld [vmem:[%s6974_s3 + $0x1c8] sm:$0xff]  }
 0x256   :  { %5431 = vmatprep.subr.bf16.mxu1 %v6326_v49 }
 0x258   :  { %3839 = vmatpush1.bf16.msra.mxu0 %v6260_v40  ;;  %v6336_v40 = vld [vmem:[%s6974_s3 + $0x1d8] sm:$0xff]  }
 0x259   :  { %5432 = vmatpush3.bf16.msra.mxu1 %v6327_v35  ;;  %3849 = vmatprep.subr.bf16.mxu0 %v6265_v43  ;;  %v6335_v35 = vld [vmem:[%s6974_s3 + $0x190] sm:$0xff]   ;;  %v6338_v43 = vld [vmem:[%s6974_s3 + $0x1e0] sm:$0xff]  }
 0x25a   :  { %5433 = vmatprep.subr.bf16.mxu1 %v6328_v41  ;;  %v6337_v41 = vld [vmem:[%s6974_s3 + $0x198] sm:$0xff]  }
 0x25b   :  { %3841 = vmatmul.mubr.bf16.vlgmr.msra.gmra.mrb[8].mxu0 %v6627_v15  ;;  %v6280_v15 = vld [vmem:[#allocation5 + $0xbb4] ss:$40 sps:$4 sm:$0xff]  }
 0x25c   :  { %3850 = vmatpush1.bf16.msra.mxu0 %v6263_v46  ;;  %3881 = vmatprep.mubr.bf16.mxu0 %v6633_v19  ;;  %v6281_v19 = vld [vmem:[#allocation5 + $0xc00] ss:$40 sps:$4 sm:$0xff]   ;;  %v6340_v46 = vld [vmem:[%s6974_s3 + $0x1e8] sm:$0xff]  }
 0x25d   :  { %5434 = vmatpush3.bf16.msra.mxu1 %v6329_v45  ;;  %3851 = vmatprep.subr.bf16.mxu0 %v6268_v48  ;;  %v6339_v45 = vld [vmem:[%s6974_s3 + $0x1a0] sm:$0xff]   ;;  %v6341_v48 = vld [vmem:[%s6974_s3 + $0x1a8] sm:$0xff]  }
 0x25e   :  { %5441 = vmatprep.subr.bf16.mxu1 %v6330_v50  ;;  %v609_v50 = vsub.s32 6, %v6665_v1 }
 0x260   :  { %3852 = vmatpush1.bf16.msra.mxu0 %v6266_v51  ;;  %v6342_v51 = vld [vmem:[%s6974_s3 + $0x1f0] sm:$0xff]  }
 0x261   :  { %3853 = vmatprep.subr.bf16.mxu0 %v6271_v53  ;;  %v613_v53 = vsub.s32 7, %v6665_v1 }
 0x264   :  { %3854 = vmatpush1.bf16.msra.mxu0 %v6269_v54  ;;  %v6343_v54 = vld [vmem:[%s6974_s3 + $0x1b0] sm:$0xff]  }
 0x265   :  { %3855 = vmatprep.subr.bf16.mxu0 %v6274_v55  ;;  %v610_v55 = vrot.slane %v6668_v9, %v609_v50 }
 0x268   :  { %3856 = vmatpush1.bf16.msra.mxu0 %v6272_v56  ;;  %v6344_v56 = vld [vmem:[%s6974_s3 + $0x1f8] sm:$0xff]  }
 0x269   :  { %3857 = vmatprep.subr.bf16.mxu0 %v6277_v57  ;;  %v614_v57 = vrot.slane %v6668_v9, %v613_v53  ;;  %v6346_v9 = vld [vmem:[%s6974_s3 + $0x200] sm:$0xff]  }
 0x26c   :  { %3858 = vmatpush1.bf16.msra.mxu0 %v6275_v58 }
 0x26d   :  { %3859 = vmatprep.subr.bf16.mxu0 %v6280_v15  ;;  %v6345_v15 = vld [vmem:[%s6974_s3 + $0x1b8] sm:$0xff]  }
 0x270   :  { %3860 = vmatpush1.bf16.msra.mxu0 %v6278_v61 }
 0x271   :  { %3861 = vmatprep.subr.bf16.mxu0 %v6283_v62 }
 0x274   :  { %3862 = vmatpush1.bf16.msra.mxu0 %v6281_v19 }
 0x275   :  { %3863 = vmatprep.subr.bf16.mxu0 %v6286_v63 }
 0x278   :  { %3864 = vmatpush1.bf16.msra.mxu0 %v6284_v2 }
 0x279   :  { %3865 = vmatprep.subr.bf16.mxu0 %v6289_v3 }
 0x27c   :  { %3866 = vmatpush1.bf16.msra.mxu0 %v6287_v4 }
 0x27d   :  { %3867 = vmatprep.subr.bf16.mxu0 %v6292_v5 }
 0x280   :  { %3868 = vmatpush1.bf16.msra.mxu0 %v6290_v6 }
 0x281   :  { %3869 = vmatprep.subr.bf16.mxu0 %v6295_v7  ;;  %v6347_v7 = vld [vmem:[%s6974_s3 + $0x208] sm:$0xff]  }
 0x284   :  { %3870 = vmatpush1.bf16.msra.mxu0 %v6293_v11  ;;  %v6348_v11 = vld [vmem:[%s6974_s3 + $0x210] sm:$0xff]  }
 0x285   :  { %3871 = vmatprep.subr.bf16.mxu0 %v6298_v12  ;;  %v6349_v12 = vld [vmem:[%s6974_s3 + $0x218] sm:$0xff]  }
 0x288   :  { %3872 = vmatpush1.bf16.msra.mxu0 %v6296_v42  ;;  %v6350_v42 = vld [vmem:[%s6974_s3 + $0x220] sm:$0xff]  }
 0x289   :  { %3873 = vmatprep.subr.bf16.mxu0 %v6301_v13  ;;  %v6351_v13 = vld [vmem:[%s6974_s3 + $0x228] sm:$0xff]  }
 0x28c   :  { %3874 = vmatpush1.bf16.msra.mxu0 %v6299_v14  ;;  %v6352_v14 = vld [vmem:[%s6974_s3 + $0x230] sm:$0xff]  }
 0x28d   :  { %3875 = vmatprep.subr.bf16.mxu0 %v6304_v16 }
 0x290   :  { %3876 = vmatpush1.bf16.msra.mxu0 %v6302_v17 }
 0x291   :  { %3877 = vmatprep.subr.bf16.mxu0 %v6307_v20 }
 0x294   :  { %3878 = vmatpush1.bf16.msra.mxu0 %v6305_v21 }
 0x295   :  { %3879 = vmatprep.subr.bf16.mxu0 %v6310_v22  ;;  %v6353_v22 = vld [vmem:[%s6974_s3 + $0x238] sm:$0xff]  }
 0x298   :  { %3880 = vmatpush1.bf16.msra.mxu0 %v6308_v24 }
 0x299   :  { %3890 = vmatprep.subr.bf16.mxu0 %v6315_v25  ;;  %v6354_v25 = vld [vmem:[%s6974_s3 + $0x240] sm:$0xff]  }
 0x29b   :  { %3882 = vmatmul.mubr.bf16.vlgmr.msra.gmra.mrb[8].mxu0 %v6641_v23 }
 0x29c   :  { %3891 = vmatpush1.bf16.msra.mxu0 %v6313_v26  ;;  %3922 = vmatprep.mubr.bf16.mxu0 %v6508_v0  ;;  %v6355_v26 = vld [vmem:[%s6974_s3 + $0x248] sm:$0xff]  }
 0x2a7   :  { %5297 = vmatmul.mubr.msk.bf16.vlgmr.msra.gmra.mrb[8].mxu0 %vm3107_vm0, %v6694_v44  ;;  %v6331_v44 = vld [vmem:[%s6974_s3 + $0x180] sm:$0xff]  }
 0x2ae   :  { %v3555_v18 = vpop.f32.mrb[4].mxu0 }
 0x2af   :  { %v5469_v32 = vadd.f32 %v3555_v18, %v602_v29  ;;  %v3557_v33 = vpop.f32.mrb[5].mxu0 }
 0x2b0   :  { %v5471_v34 = vadd.f32 %v3557_v33, %v606_v31  ;;  %v3559_v30 = vpop.f32.mrb[6].mxu0 }
 0x2b1   :  { %v5470_v23 = vadd.f32 %v5469_v32, %v6710_v59  ;;  %v3560_v36 = vpop.f32.mrb[7].mxu0  ;;  %v6333_v59 = vld [vmem:[%s6974_s3 + $0x188] sm:$0xff]  }
 0x2b2   :  { %v5472_v47 = vadd.f32 %v5471_v34, %v6712_v60  ;;  %v6334_v60 = vld [vmem:[%s6974_s3 + $0x1d0] sm:$0xff]   ;;  %s6509_s3 = smov 112  }
 0x2b3   :  { %v3935_v37 = vmax.f32 %v5470_v23, 0.0  ;;  %v580_v23 = vld [vmem:[#allocation7 + $0x8] sm:$0x3] }
 0x2b4   :  { %v3936_v8 = vmax.f32 %v5472_v47, 0.0  ;;  %v618_v36 = vrot.slane %v580_v23, %v585_v52  ;;  %v622_v47 = vrot.slane %v580_v23, %v589_v10 }
 0x2b5   :  { %v3945_v49 = vpack.c.bf16 %v3935_v37, %v3935_v37 }
 0x2b6   :  { %v3946_v38 = vpack.c.bf16 %v3936_v8, %v3936_v8 }
 0x2b8   :  { %4674 = vmatprep.mubr.bf16.mxu1 %v3946_v38 }
 0x2b9   :  { %4675 = vmatmul.mubr.bf16.vlgmr.msra.gmra.mrb[24].mxu1 %v3945_v49 }
 0x2ba   :  { %5442 = vmatpush3.bf16.msra.mxu1 %v6331_v44 }
 0x2bb   :  { %5443 = vmatprep.subr.bf16.mxu1 %v6332_v39 }
 0x2be   :  { %5444 = vmatpush3.bf16.msra.mxu1 %v6333_v59 }
 0x2bf   :  { %5445 = vmatprep.subr.bf16.mxu1 %v6334_v60 }
 0x2c2   :  { %5446 = vmatpush3.bf16.msra.mxu1 %v6335_v35 }
 0x2c3   :  { %5447 = vmatprep.subr.bf16.mxu1 %v6336_v40 }
 0x2c6   :  { %5448 = vmatpush3.bf16.msra.mxu1 %v6337_v41 }
 0x2c7   :  { %5449 = vmatprep.subr.bf16.mxu1 %v6338_v43 }
 0x2ca   :  { %5450 = vmatpush3.bf16.msra.mxu1 %v6339_v45 }
 0x2cb   :  { %5451 = vmatprep.subr.bf16.mxu1 %v6340_v46 }
 0x2ce   :  { %5452 = vmatpush3.bf16.msra.mxu1 %v6341_v48 }
 0x2cf   :  { %5453 = vmatprep.subr.bf16.mxu1 %v6342_v51 }
 0x2d2   :  { %5454 = vmatpush3.bf16.msra.mxu1 %v6343_v54 }
 0x2d3   :  { %v3760_v58 = vpop.f32.mrb[12].mxu1  ;;  %5455 = vmatprep.subr.bf16.mxu1 %v6344_v56 }
 0x2d4   :  { %v5473_v61 = vadd.f32 %v3760_v58, %v610_v55  ;;  %v3762_v62 = vpop.f32.mrb[13].mxu1 }
 0x2d5   :  { %v5474_v19 = vadd.f32 %v3762_v62, %v614_v57  ;;  %v3764_v63 = vpop.f32.mrb[14].mxu1 }
 0x2d6   :  { %v3937_v2 = vmax.f32 %v5473_v61, 0.0  ;;  %v3765_v3 = vpop.f32.mrb[15].mxu1  ;;  %5456 = vmatpush3.bf16.msra.mxu1 %v6345_v15 }
 0x2d7   :  { %v3938_v4 = vmax.f32 %v5474_v19, 0.0  ;;  %4722 = vmatprep.subr.bf16.mxu1 %v6508_v0  ;;  %v4762_v19 = vld [vmem:[#allocation10] sm:$0xff] }
 0x2d8   :  { %v3947_v6 = vpack.c.bf16 %v3937_v2, %v3937_v2 }
 0x2d9   :  { %v3948_v5 = vpack.c.bf16 %v3938_v4, %v3938_v4 }
 0x2db   :  { %4714 = vmatprep.mubr.bf16.mxu1 %v3948_v5 }
 0x2dc   :  { %4715 = vmatmul.mubr.bf16.vlgmr.msra.gmra.mrb[28].mxu1 %v3947_v6 }
 0x2dd   :  { %4723 = vmatpush1.bf16.msra.mxu1 %v6346_v9 }
 0x2de   :  { %4724 = vmatprep.subr.bf16.mxu1 %v6508_v0 }
 0x2e1   :  { %4725 = vmatpush1.bf16.msra.mxu1 %v6347_v7 }
 0x2e2   :  { %4726 = vmatprep.subr.bf16.mxu1 %v6508_v0 }
 0x2e5   :  { %4727 = vmatpush1.bf16.msra.mxu1 %v6348_v11 }
 0x2e6   :  { %4728 = vmatprep.subr.bf16.mxu1 %v6508_v0 }
 0x2e9   :  { %4729 = vmatpush1.bf16.msra.mxu1 %v6349_v12 }
 0x2ea   :  { %4730 = vmatprep.subr.bf16.mxu1 %v6508_v0 }
 0x2ed   :  { %4731 = vmatpush1.bf16.msra.mxu1 %v6350_v42 }
 0x2ee   :  { %4732 = vmatprep.subr.bf16.mxu1 %v6508_v0 }
 0x2f1   :  { %4733 = vmatpush1.bf16.msra.mxu1 %v6351_v13 }
 0x2f2   :  { %4734 = vmatprep.subr.bf16.mxu1 %v6508_v0 }
 0x2f3   :  { %v5391_v16 = vpop.f32.mrb[16].mxu1 }
 0x2f4   :  { %v5392_v17 = vpop.f32.mrb[17].mxu1 }
 0x2f5   :  { %v5393_v20 = vadd.f32 %v5392_v17, %v5391_v16  ;;  %v5394_v21 = vpop.f32.mrb[18].mxu1  ;;  %4735 = vmatpush1.bf16.msra.mxu1 %v6352_v14 }
 0x2f6   :  { %v5395_v24 = vpop.f32.mrb[19].mxu1  ;;  %4736 = vmatprep.subr.bf16.mxu1 %v6508_v0 }
 0x2f7   :  { %v4597_v18 = vadd.f32 %v5393_v20, %v5298_v28 }
 0x2f9   :  { %4737 = vmatpush1.bf16.msra.mxu1 %v6353_v22 }
 0x2fa   :  { %4738 = vmatprep.subr.bf16.mxu1 %v6508_v0 }
 0x2fd   :  { %4739 = vmatpush1.bf16.msra.mxu1 %v6354_v25 }
 0x2fe   :  { %4740 = vmatprep.subr.bf16.mxu1 %v6508_v0 }
 0x301   :  { %4741 = vmatpush1.bf16.msra.mxu1 %v6355_v26 }
 0x302   :  { %4742 = vmatprep.subr.bf16.mxu1 %v6508_v0 }
 0x305   :  { %4743 = vmatpush1.bf16.msra.mxu1 %v6356_v27 }
 0x313   :  { %v5413_v29 = vpop.f32.mrb[20].mxu1 }
 0x314   :  { %v5414_v31 = vpop.f32.mrb[21].mxu1 }
 0x315   :  { %v5415_v32 = vadd.f32 %v5414_v31, %v5413_v29  ;;  %v5416_v33 = vpop.f32.mrb[22].mxu1 }
 0x316   :  { %v5417_v34 = vpop.f32.mrb[23].mxu1 }
 0x317   :  { %v4637_v30 = vadd.f32 %v5415_v32, %v4597_v18 }
 0x37a   :  { %v3924_v37 = vpop.f32.mrb[8].mxu0 }
 0x37b   :  { %v5475_v8 = vadd.f32 %v3924_v37, %v618_v36  ;;  %v3926_v38 = vpop.f32.mrb[9].mxu0 }
 0x37c   :  { %v5476_v0 = vadd.f32 %v3926_v38, %v622_v47  ;;  %v3928_v44 = vpop.f32.mrb[10].mxu0 }
 0x37d   :  { %v3939_v49 = vmax.f32 %v5475_v8, 0.0  ;;  %v3929_v39 = vpop.f32.mrb[11].mxu0 }
 0x37e   :  { %v3940_v59 = vmax.f32 %v5476_v0, 0.0 }
 0x37f   :  { %v3949_v35 = vpack.c.bf16 %v3939_v49, %v3939_v49 }
 0x380   :  { %v3950_v60 = vpack.c.bf16 %v3940_v59, %v3940_v59 }
 0x382   :  { %5374 = vmatprep.mubr.msk.bf16.mxu1 %vm4558_vm1, %v3950_v60 }
 0x383   :  { %4755 = vmatmul.mubr.bf16.vlgmr.msra.gmra.mrb[32].mxu1 %v3949_v35 }
 0x38c   :  { %v5435_v40 = vpop.f32.mrb[24].mxu1 }
 0x38d   :  { %v5436_v41 = vpop.f32.mrb[25].mxu1 }
 0x38e   :  { %v5437_v52 = vadd.f32 %v5436_v41, %v5435_v40  ;;  %v5438_v43 = vpop.f32.mrb[26].mxu1 }
 0x38f   :  { %v5439_v1 = vpop.f32.mrb[27].mxu1 }
 0x390   :  { %v4677_v10 = vadd.f32 %v5437_v52, %v4637_v30 }
 0x3af   :  { %v5457_v45 = vpop.f32.mrb[28].mxu1 }
 0x3b0   :  { %v5458_v46 = vpop.f32.mrb[29].mxu1 }
 0x3b1   :  { %v5459_v48 = vadd.f32 %v5458_v46, %v5457_v45  ;;  %v5460_v50 = vpop.f32.mrb[30].mxu1 }
 0x3b2   :  { %v5461_v51 = vpop.f32.mrb[31].mxu1 }
 0x3b3   :  { %v4717_v53 = vadd.f32 %v5459_v48, %v4677_v10 }
 0x456   :  { %v4756_v54 = vpop.f32.mrb[32].mxu1 }
 0x457   :  { %v4757_v55 = vadd.f32 %v4756_v54, %v4717_v53  ;;  %v4758_v56 = vpop.f32.mrb[33].mxu1 }
 0x458   :  { %v4759_v57 = vpop.f32.mrb[34].mxu1 }
 0x459   :  { %v4763_v58 = vmul.f32 0.5, %v4757_v55  ;;  %v4760_v15 = vpop.f32.mrb[35].mxu1 }
 0x45b   :  { %v4764_v61 = vmul.f32 1.442695, %v4763_v58 }
 0x45d   :  { %6357 = vpow2.f32 %v4764_v61 }
 0x467   :  { %v6358_v62 = vpop.eup %6357 }
 0x468   :  { %4767 = vrot.lane.b32.xlu0 %v6358_v62, %s6509_s3 }
 0x4da   :  { %v4768_v63 = vpop.permute.xlu0 %4767 }
 0x4db   :  { %v4770_v2 = vmul.f32 %v4768_v63, %v4762_v19 }
 0x4dd   :  { %v4771_v3 = vadd.f32 %v4770_v2, %v4757_v55 }
 0x4df   :  { %4773 = vrot.lane.b32.xlu0 %v4771_v3, %s6510_s10 }
 0x551   :  { %v4774_v4 = vpop.permute.xlu0 %4773 }
 0x552   :  { %v4777_v5 = vsel %vm4776_vm2, %v4757_v55, %v4774_v4 }
 0x553   :  { %4778 = vst.msk [vmem:[#allocation11] sm:$0xff] %vm4558_vm1, %v4777_v5 }
 0x554   :  { %6482 = shalt.err (!%p6479_p2)
}
 0x555   :  { %s6483_s17 = scalar_lea.hbm %s6977_s6, 128 }
 0x556   :  { %p6484_p3 = scmp.ne.s32.totalorder %s6977_s6, %s6483_s17  ;;  %p6487_p4 = scmp.lt.u32.totalorder %s6483_s17, %s6977_s6 }
 0x558   :  { %p6489_p5 = pnand %p6487_p4, %p6484_p3 }
 0x55a   :  { %6492 = shalt.err (!%p6489_p5)
}
 0x55b   :  { %4788 = dma.vmem_to_hbm [thread:$0]  %s4786_s12, 128, %s6977_s6, [#allocation4]  }
 0x55c   :  { %6499 = dma.done.wait [#allocation4], 128  }
 0x55d   :  { %6500 = vsyncadd [#allocation4], 4294967168 }
 0x55e   :  { %4792 = vsyncpa [#allocation3], 1 }
 0x55f   :  { %4793 = vsyncpa [#allocation6], 1 }
 0x560   :  { %4794 = vsyncpa [#allocation9], 1 }
 0x561   :  { %4795 = vsyncpa [#allocation4], 1 }

</bundles_post_ra>
